<compile_context>
chip_gen: v7x
topology: tpu7x:2x2x1
jax: 0.10.0
libtpu: 0.0.40
codegen_flags: <defaults>
</compile_context>

<pallas_src>
import numpy as np
import jax
import jax.numpy as jnp
from jax.experimental import pallas as pl
from jax.experimental.pallas import tpu as pltpu
from jax.scipy.linalg import block_diag

# ----------------------------- configuration -------------------------------
B = 2                      # batch
H = 32                     # hidden_dim (scaled down from 512)
H3 = 3 * H                 # three modalities packed on the lane axis
SPEECH_DIM = 16            # speech feature dim (scaled down from 80)
T_SPEECH = 8               # speech frames
IMG = 16                   # vision spatial (scaled down from 224)
PATCH = 8                  # vision patch size -> 4 patches
T_TEXT = 8                 # text tokens
VOCAB = 100                # vocab size (scaled down from 30000)
VOCAB_PAD = ((VOCAB + 7) // 8) * 8
NUM_CLASSES = 10
NUM_HEADS = 8
HEAD_DIM = H // NUM_HEADS
SCALE = 1.0 / float(HEAD_DIM) ** 0.5
PATCH_DIM = 3 * PATCH * PATCH          # 192
N_PATCH = (IMG // PATCH) ** 2          # 4
PACK_ROWS = B * T_SPEECH               # 16 rows in the packed activation
ATT_ROWS = B * 3 * 3                   # 18 batched (batch, query, key) rows
CLS_PAD = 128                          # lane-dense padded logits width
N_MOD_LAYERS = 10                      # linears per AdaptiveModalityProcessor

# ------------------- packed weight-slab layout (static) ---------------------
# All weights + constant matrices live in ONE bf16 (W_ROWS, W_COLS) slab so
# the kernel prologue is a single DMA.  Offsets are static Python ints and are
# 16-row aligned (bf16 sublane tile).
_W_SPECS = [
    ("w_sv",  SPEECH_DIM + PATCH_DIM, 2 * H),    # speech|vision encoder (block-diag)
    ("te",    VOCAB_PAD, H),                     # text_emb @ te_w folded, row-padded
    ("w01",   H3, 2 * H3),                       # modality layers 0(hidden)|1(gate), fused along N
    ("wmod",  (N_MOD_LAYERS - 2) * H3, H3),      # modality layers 2..9, block-diag
    ("wqkv",  H3, H3),                           # shared QKV proj, vstacked for blocked tokens
    ("wo",    H, H),                             # fusion output projection
    ("wc1",   H, 2 * H),                         # classifier layer 1
    ("wc2",   2 * H, CLS_PAD),                   # classifier layer 2 (lane-padded)
    ("pool",  3 * B, PACK_ROWS),                 # constant pooling matmul
    ("mask",  3 * B, H3),                        # modality-block mask for pooled tokens
    ("hsum",  H, NUM_HEADS),                     # lane-dense head sum
    ("hsumT", NUM_HEADS, H),                     # head broadcast back to lanes
    ("qexp",  ATT_ROWS, 3 * B),                  # query replication over (b,i,j)
    ("kexp",  ATT_ROWS, 3 * B),                  # key/value replication over (b,i,j)
    ("gsum",  3 * B, ATT_ROWS),                  # softmax group-sum over keys
    ("gbc",   ATT_ROWS, 3 * B),                  # softmax group broadcast
    ("bsum",  B, ATT_ROWS),                      # per-batch sum over (query, key)
]
_W = {}
_off = 0
for _n, _r, _c in _W_SPECS:
    _W[_n] = (_off, _r, _c)
    _off += ((_r + 15) // 16) * 16
W_ROWS = _off
W_COLS = 2 * H3                                  # 192 lanes

# bias slab rows (f32, width W_COLS); zero-initialized like the baseline.
_B_SV, _B_TX, _B_01, _B_MOD0, _B_QKV, _B_WO, _B_C1, _B_C2 = 0, 1, 2, 3, 11, 12, 13, 14
B_SLAB_ROWS = 16


# ------------------------------ fused kernel --------------------------------
def _fused_forward_kernel(sv_ref, tid_ref, w_ref, b_ref, o_ref):
    f32, bf16 = jnp.float32, jnp.bfloat16

    def w(name):
        off, r, c = _W[name]
        return w_ref[off:off + r, 0:c]                       # bf16, static slice

    def bias(row, c):
        return b_ref[row:row + 1, 0:c]                       # f32 (1, c)

    def mm(x, name):                                         # bf16 MXU, f32 accumulate
        return jnp.dot(x.astype(bf16), w(name), preferred_element_type=f32)

    # --- encoders: speech|vision in one block-diag matmul; text gather in-kernel ---
    y_sv = mm(sv_ref[...], "w_sv") + bias(_B_SV, 2 * H)       # (16, 64)
    sp_enc = jnp.tanh(y_sv[:, 0:H])                           # SpeechEncoder
    vi_enc = jnp.maximum(y_sv[:, H:2 * H], 0.0)               # VisionProcessor patch-embed

    ids = tid_ref[...]                                        # (16, 1) int32
    cols = jax.lax.broadcasted_iota(jnp.int32, (PACK_ROWS, VOCAB_PAD), 1)
    onehot = (cols == ids).astype(bf16)                       # (16, VOCAB_PAD)
    tx_enc = jnp.tanh(jnp.dot(onehot, w("te"), preferred_element_type=f32)
                      + bias(_B_TX, H))                       # TextProcessor

    x = jnp.concatenate([sp_enc, vi_enc, tx_enc], axis=1)     # (16, 96) packed activation

    # --- AdaptiveModalityProcessor x3, fused block-diagonally ---
    # layers: 0 adaptive-hidden, 1 adaptive-gate (fused along N), 2-3 meta MLP,
    #         4-7 two residual EvolutionaryLayers, 8-9 output head.
    y01 = mm(x, "w01") + bias(_B_01, 2 * H3)                  # (16, 192)
    h = jnp.maximum(y01[:, 0:H3], 0.0)
    g = 0.5 * (jnp.tanh(0.5 * y01[:, H3:2 * H3]) + 1.0)       # sigmoid via EUP tanh
    x = h * g

    def mlin(v, l):                                           # modality layers 2..9
        off = _W["wmod"][0] + (l - 2) * H3
        wl = w_ref[off:off + H3, 0:H3]
        return jnp.dot(v.astype(bf16), wl, preferred_element_type=f32) \
            + bias(_B_MOD0 + l - 2, H3)

    x = jnp.maximum(mlin(x, 2), 0.0)
    x = mlin(x, 3)
    h = jnp.maximum(mlin(x, 4), 0.0)
    x = x + mlin(h, 5)
    h = jnp.maximum(mlin(x, 6), 0.0)
    x = x + mlin(h, 7)
    h = jnp.maximum(mlin(x, 8), 0.0)
    x = mlin(h, 9)                                            # (16, 96)

    # --- CrossModalFusion: constant-matmul pooling + batched 8-head attention ---
    tok = jnp.dot(w("pool"), x.astype(bf16), preferred_element_type=f32)        # (6, 96)
    tok = tok * w("mask").astype(f32)                         # keep each token's own block
    qkv = mm(tok, "wqkv") + bias(_B_QKV, H3)                  # (6, 96) = [q | k | v]

    q_rep = jnp.dot(w("qexp"), qkv[:, 0:H].astype(bf16),
                    preferred_element_type=f32)               # (18, 32)
    kv_rep = jnp.dot(w("kexp"), qkv[:, H:3 * H].astype(bf16),
                     preferred_element_type=f32)              # (18, 64) = [k_rep | v_rep]
    k_rep, v_rep = kv_rep[:, 0:H], kv_rep[:, H:2 * H]

    s = jnp.dot((q_rep * k_rep).astype(bf16), w("hsum"),
                preferred_element_type=f32) * SCALE           # (18, 8) per-head scores
    e = jnp.exp(s - jnp.max(s, keepdims=True))                # shared shift: softmax-invariant
    den = jnp.dot(w("gsum"), e.astype(bf16), preferred_element_type=f32)        # (6, 8)
    den = jnp.dot(w("gbc"), den.astype(bf16), preferred_element_type=f32)       # (18, 8)
    p = e * pl.reciprocal(den, approx=True)
    pe = jnp.dot(p.astype(bf16), w("hsumT"), preferred_element_type=f32)        # (18, 32)
    fused = jnp.dot(w("bsum"), (pe * v_rep).astype(bf16),
                    preferred_element_type=f32) * (1.0 / 3.0)                   # (2, 32)
    fused = mm(fused, "wo") + bias(_B_WO, H)

    # --- classifier: Linear -> ReLU -> Dropout(eval=identity) -> Linear ---
    hcls = jnp.maximum(mm(fused, "wc1") + bias(_B_C1, 2 * H), 0.0)              # (2, 64)
    o_ref[...] = mm(hcls, "wc2") + bias(_B_C2, CLS_PAD)                         # (2, 128)


# ------------------------------ parameter init ------------------------------
def _glorot(key, shape):
    return jax.random.normal(key, shape, jnp.float32) / jnp.sqrt(jnp.float32(shape[0]))


def init_params(key):
    ks = jax.random.split(key, 9)
    f32 = jnp.float32

    se_w = _glorot(ks[0], (SPEECH_DIM, H))
    ve_w = _glorot(ks[1], (PATCH_DIM, H))
    text_emb = jax.random.normal(ks[2], (VOCAB, H), f32) * 0.02
    te_w = _glorot(ks[3], (H, H))

    mod_keys = jax.random.split(ks[4], 3 * N_MOD_LAYERS)
    wmod = [_glorot(k, (H, H)) for k in mod_keys]            # index: modality*10 + layer

    wqkv = _glorot(ks[5], (H, 3 * H))
    wo_w = _glorot(ks[6], (H, H))
    wc1 = _glorot(ks[7], (H, 2 * H))
    wc2 = _glorot(ks[8], (2 * H, NUM_CLASSES))

    pieces = {}
    pieces["w_sv"] = block_diag(se_w, ve_w)                                   # (208, 64)
    pieces["te"] = jnp.pad(text_emb @ te_w, ((0, VOCAB_PAD - VOCAB), (0, 0)))  # fold emb+linear

    def layer_bd(l):   # block-diag of the 3 modalities' layer-l weights
        return block_diag(wmod[0 * N_MOD_LAYERS + l],
                          wmod[1 * N_MOD_LAYERS + l],
                          wmod[2 * N_MOD_LAYERS + l])

    pieces["w01"] = jnp.concatenate([layer_bd(0), layer_bd(1)], axis=1)       # (96, 192)
    pieces["wmod"] = jnp.concatenate([layer_bd(l) for l in range(2, N_MOD_LAYERS)], axis=0)
    pieces["wqkv"] = jnp.concatenate([wqkv] * 3, axis=0)                      # (96, 96)
    pieces["wo"] = wo_w
    pieces["wc1"] = wc1
    pieces["wc2"] = jnp.pad(wc2, ((0, 0), (0, CLS_PAD - NUM_CLASSES)))

    # constant matrices: pooling, block mask, head sum/broadcast, attention batching
    P = np.zeros((3 * B, PACK_ROWS), np.float32)
    mask = np.zeros((3 * B, H3), np.float32)
    for b in range(B):
        P[b * 3 + 0, b * T_SPEECH:(b + 1) * T_SPEECH] = 1.0 / T_SPEECH
        P[b * 3 + 1, b * N_PATCH:(b + 1) * N_PATCH] = 1.0 / N_PATCH   # excludes zero-padded rows
        P[b * 3 + 2, b * T_TEXT:(b + 1) * T_TEXT] = 1.0 / T_TEXT
        for m in range(3):
            mask[b * 3 + m, m * H:(m + 1) * H] = 1.0
    pieces["pool"] = jnp.asarray(P)
    pieces["mask"] = jnp.asarray(mask)

    hsum = (np.arange(H)[:, None] // HEAD_DIM == np.arange(NUM_HEADS)[None, :]).astype(np.float32)
    pieces["hsum"] = jnp.asarray(hsum)
    pieces["hsumT"] = jnp.asarray(hsum.T)

    qexp = np.zeros((ATT_ROWS, 3 * B), np.float32)
    kexp = np.zeros((ATT_ROWS, 3 * B), np.float32)
    gsum = np.zeros((3 * B, ATT_ROWS), np.float32)
    bsum = np.zeros((B, ATT_ROWS), np.float32)
    for b in range(B):
        for i in range(3):
            for j in range(3):
                r = b * 9 + i * 3 + j
                qexp[r, b * 3 + i] = 1.0
                kexp[r, b * 3 + j] = 1.0
                gsum[b * 3 + i, r] = 1.0
                bsum[b, r] = 1.0
    pieces["qexp"] = jnp.asarray(qexp)
    pieces["kexp"] = jnp.asarray(kexp)
    pieces["gsum"] = jnp.asarray(gsum)
    pieces["gbc"] = jnp.asarray(gsum.T)
    pieces["bsum"] = jnp.asarray(bsum)

    # pack into the single bf16 weight slab
    wslab = jnp.zeros((W_ROWS, W_COLS), jnp.float32)
    for name, arr in pieces.items():
        off, r, c = _W[name]
        assert arr.shape == (r, c), (name, arr.shape, (r, c))
        wslab = wslab.at[off:off + r, 0:c].set(arr)
    wslab = wslab.astype(jnp.bfloat16)

    # nn.Linear biases, zero-initialized (same as baseline), packed as rows (f32)
    bslab = jnp.zeros((B_SLAB_ROWS, W_COLS), jnp.float32)

    return {"wslab": wslab, "bslab": bslab}


# --------------------------------- forward ----------------------------------
def fused_forward(params, speech_input, vision_input, text_input):
    # vision patchify is pure layout; kept as XLA glue.  Everything else is in-kernel.
    gh = IMG // PATCH
    v = vision_input.reshape(B, 3, gh, PATCH, gh, PATCH)
    v = v.transpose(0, 2, 4, 1, 3, 5).reshape(B * N_PATCH, PATCH_DIM)        # (8, 192)
    v = jnp.pad(v, ((0, PACK_ROWS - B * N_PATCH), (0, 0)))                   # rows ignored by pooling
    sp = speech_input.reshape(B * T_SPEECH, SPEECH_DIM)                      # (16, 16)
    sv = jnp.concatenate([sp, v], axis=1)                                    # (16, 208) one packed DMA
    tids = text_input.reshape(B * T_TEXT, 1).astype(jnp.int32)               # (16, 1)

    vmem = pl.BlockSpec(memory_space=pltpu.MemorySpace.VMEM)
    logits_pad = pl.pallas_call(
        _fused_forward_kernel,
        out_shape=jax.ShapeDtypeStruct((B, CLS_PAD), jnp.float32),
        in_specs=[vmem, vmem, vmem, vmem],
        out_specs=vmem,
    )(sv, tids, params["wslab"], params["bslab"])
    return logits_pad[:, :NUM_CLASSES]


# ----------------------------------- main ------------------------------------
if __name__ == "__main__":
    key = jax.random.PRNGKey(0)
    k_param, k_speech, k_vision, k_text = jax.random.split(key, 4)

    params = init_params(k_param)
    speech_input = jax.random.normal(k_speech, (B, T_SPEECH, SPEECH_DIM), jnp.float32)
    vision_input = jax.random.normal(k_vision, (B, 3, IMG, IMG), jnp.float32)  # NCHW
    text_input = jax.random.randint(k_text, (B, T_TEXT), 0, VOCAB, jnp.int32)

    out = jax.jit(fused_forward)(params, speech_input, vision_input, text_input)
    out = jax.block_until_ready(out)
    assert out.shape == (B, NUM_CLASSES), out.shape
    assert bool(jnp.all(jnp.isfinite(out)))
    print("KERNEL_OK")
</pallas_src>

<mosaic_0001>
module attributes {stable_mosaic.version = 11 : i64} {
  func.func @_fused_forward_kernel(%arg0: memref<16x208xf32, #tpu.memory_space<vmem>>, %arg1: memref<16x1xi32, #tpu.memory_space<vmem>>, %arg2: memref<1616x192xbf16, #tpu.memory_space<vmem>>, %arg3: memref<16x192xf32, #tpu.memory_space<vmem>>, %arg4: memref<2x128xf32, #tpu.memory_space<vmem>>) attributes {dimension_semantics = [], scalar_prefetch = 0 : i64, scratch_operands = 0 : i64, tpu.core_type = #tpu.core_type<tc>} {
    %c0 = arith.constant 0 : index
    %c0_0 = arith.constant 0 : index
    %0 = vector.load %arg0[%c0, %c0_0] : memref<16x208xf32, #tpu.memory_space<vmem>>, vector<16x208xf32>
    %1 = arith.truncf %0 : vector<16x208xf32> to vector<16x208xbf16>
    %c0_1 = arith.constant 0 : index
    %c0_2 = arith.constant 0 : index
    %2 = vector.load %arg2[%c0_1, %c0_2] : memref<1616x192xbf16, #tpu.memory_space<vmem>>, vector<208x64xbf16>
    %cst = arith.constant dense<0.000000e+00> : vector<16x64xf32>
    %3 = tpu.matmul %1, %2, %cst {dimension_numbers = #tpu.dot_dimension_numbers<[1], [0], [0], [1], [0, 0, 1, 1], [], []>} : vector<16x208xbf16>, vector<208x64xbf16>, vector<16x64xf32> -> vector<16x64xf32>
    %c0_3 = arith.constant 0 : index
    %c0_4 = arith.constant 0 : index
    %4 = vector.load %arg3[%c0_3, %c0_4] : memref<16x192xf32, #tpu.memory_space<vmem>>, vector<1x64xf32>
    %5 = vector.broadcast %4 : vector<1x64xf32> to vector<16x64xf32>
    %6 = arith.addf %3, %5 : vector<16x64xf32>
    %7 = vector.extract_strided_slice %6 {offsets = [0, 0], sizes = [16, 32], strides = [1, 1]} : vector<16x64xf32> to vector<16x32xf32>
    %8 = math.tanh %7 : vector<16x32xf32>
    %9 = vector.extract_strided_slice %6 {offsets = [0, 32], sizes = [16, 32], strides = [1, 1]} : vector<16x64xf32> to vector<16x32xf32>
    %cst_5 = arith.constant 0.000000e+00 : f32
    %10 = vector.broadcast %cst_5 : f32 to vector<16x32xf32>
    %11 = arith.maximumf %9, %10 : vector<16x32xf32>
    %c0_6 = arith.constant 0 : index
    %c0_7 = arith.constant 0 : index
    %12 = vector.load %arg1[%c0_6, %c0_7] : memref<16x1xi32, #tpu.memory_space<vmem>>, vector<16x1xi32>
    %13 = tpu.iota {dimensions = array<i32: 1>} : vector<16x104xi32>
    %14 = vector.broadcast %12 : vector<16x1xi32> to vector<16x104xi32>
    %15 = arith.cmpi eq, %13, %14 : vector<16x104xi32>
    %16 = arith.extui %15 : vector<16x104xi1> to vector<16x104xi32>
    %17 = arith.sitofp %16 : vector<16x104xi32> to vector<16x104xf32>
    %18 = arith.truncf %17 : vector<16x104xf32> to vector<16x104xbf16>
    %c208 = arith.constant 208 : index
    %c0_8 = arith.constant 0 : index
    %19 = vector.load %arg2[%c208, %c0_8] : memref<1616x192xbf16, #tpu.memory_space<vmem>>, vector<104x32xbf16>
    %cst_9 = arith.constant dense<0.000000e+00> : vector<16x32xf32>
    %20 = tpu.matmul %18, %19, %cst_9 {dimension_numbers = #tpu.dot_dimension_numbers<[1], [0], [0], [1], [0, 0, 1, 1], [], []>} : vector<16x104xbf16>, vector<104x32xbf16>, vector<16x32xf32> -> vector<16x32xf32>
    %c1 = arith.constant 1 : index
    %c0_10 = arith.constant 0 : index
    %21 = vector.load %arg3[%c1, %c0_10] : memref<16x192xf32, #tpu.memory_space<vmem>>, vector<1x32xf32>
    %22 = vector.broadcast %21 : vector<1x32xf32> to vector<16x32xf32>
    %23 = arith.addf %20, %22 : vector<16x32xf32>
    %24 = math.tanh %23 : vector<16x32xf32>
    %25 = tpu.concatenate %8, %11, %24 in 1 : vector<16x32xf32>, vector<16x32xf32>, vector<16x32xf32> -> vector<16x96xf32>
    %26 = arith.truncf %25 : vector<16x96xf32> to vector<16x96xbf16>
    %c320 = arith.constant 320 : index
    %c0_11 = arith.constant 0 : index
    %27 = vector.load %arg2[%c320, %c0_11] : memref<1616x192xbf16, #tpu.memory_space<vmem>>, vector<96x192xbf16>
    %cst_12 = arith.constant dense<0.000000e+00> : vector<16x192xf32>
    %28 = tpu.matmul %26, %27, %cst_12 {dimension_numbers = #tpu.dot_dimension_numbers<[1], [0], [0], [1], [0, 0, 1, 1], [], []>} : vector<16x96xbf16>, vector<96x192xbf16>, vector<16x192xf32> -> vector<16x192xf32>
    %c2 = arith.constant 2 : index
    %c0_13 = arith.constant 0 : index
    %29 = vector.load %arg3[%c2, %c0_13] : memref<16x192xf32, #tpu.memory_space<vmem>>, vector<1x192xf32>
    %30 = vector.broadcast %29 : vector<1x192xf32> to vector<16x192xf32>
    %31 = arith.addf %28, %30 : vector<16x192xf32>
    %32 = vector.extract_strided_slice %31 {offsets = [0, 0], sizes = [16, 96], strides = [1, 1]} : vector<16x192xf32> to vector<16x96xf32>
    %cst_14 = arith.constant 0.000000e+00 : f32
    %33 = vector.broadcast %cst_14 : f32 to vector<16x96xf32>
    %34 = arith.maximumf %32, %33 : vector<16x96xf32>
    %35 = vector.extract_strided_slice %31 {offsets = [0, 96], sizes = [16, 96], strides = [1, 1]} : vector<16x192xf32> to vector<16x96xf32>
    %cst_15 = arith.constant 5.000000e-01 : f32
    %36 = vector.broadcast %cst_15 : f32 to vector<16x96xf32>
    %37 = arith.mulf %36, %35 : vector<16x96xf32>
    %38 = math.tanh %37 : vector<16x96xf32>
    %cst_16 = arith.constant 1.000000e+00 : f32
    %39 = vector.broadcast %cst_16 : f32 to vector<16x96xf32>
    %40 = arith.addf %38, %39 : vector<16x96xf32>
    %cst_17 = arith.constant 5.000000e-01 : f32
    %41 = vector.broadcast %cst_17 : f32 to vector<16x96xf32>
    %42 = arith.mulf %41, %40 : vector<16x96xf32>
    %43 = arith.mulf %34, %42 : vector<16x96xf32>
    %c416 = arith.constant 416 : index
    %c0_18 = arith.constant 0 : index
    %44 = vector.load %arg2[%c416, %c0_18] : memref<1616x192xbf16, #tpu.memory_space<vmem>>, vector<96x96xbf16>
    %45 = arith.truncf %43 : vector<16x96xf32> to vector<16x96xbf16>
    %cst_19 = arith.constant dense<0.000000e+00> : vector<16x96xf32>
    %46 = tpu.matmul %45, %44, %cst_19 {dimension_numbers = #tpu.dot_dimension_numbers<[1], [0], [0], [1], [0, 0, 1, 1], [], []>} : vector<16x96xbf16>, vector<96x96xbf16>, vector<16x96xf32> -> vector<16x96xf32>
    %c3 = arith.constant 3 : index
    %c0_20 = arith.constant 0 : index
    %47 = vector.load %arg3[%c3, %c0_20] : memref<16x192xf32, #tpu.memory_space<vmem>>, vector<1x96xf32>
    %48 = vector.broadcast %47 : vector<1x96xf32> to vector<16x96xf32>
    %49 = arith.addf %46, %48 : vector<16x96xf32>
    %cst_21 = arith.constant 0.000000e+00 : f32
    %50 = vector.broadcast %cst_21 : f32 to vector<16x96xf32>
    %51 = arith.maximumf %49, %50 : vector<16x96xf32>
    %c512 = arith.constant 512 : index
    %c0_22 = arith.constant 0 : index
    %52 = vector.load %arg2[%c512, %c0_22] : memref<1616x192xbf16, #tpu.memory_space<vmem>>, vector<96x96xbf16>
    %53 = arith.truncf %51 : vector<16x96xf32> to vector<16x96xbf16>
    %cst_23 = arith.constant dense<0.000000e+00> : vector<16x96xf32>
    %54 = tpu.matmul %53, %52, %cst_23 {dimension_numbers = #tpu.dot_dimension_numbers<[1], [0], [0], [1], [0, 0, 1, 1], [], []>} : vector<16x96xbf16>, vector<96x96xbf16>, vector<16x96xf32> -> vector<16x96xf32>
    %c4 = arith.constant 4 : index
    %c0_24 = arith.constant 0 : index
    %55 = vector.load %arg3[%c4, %c0_24] : memref<16x192xf32, #tpu.memory_space<vmem>>, vector<1x96xf32>
    %56 = vector.broadcast %55 : vector<1x96xf32> to vector<16x96xf32>
    %57 = arith.addf %54, %56 : vector<16x96xf32>
    %c608 = arith.constant 608 : index
    %c0_25 = arith.constant 0 : index
    %58 = vector.load %arg2[%c608, %c0_25] : memref<1616x192xbf16, #tpu.memory_space<vmem>>, vector<96x96xbf16>
    %59 = arith.truncf %57 : vector<16x96xf32> to vector<16x96xbf16>
    %cst_26 = arith.constant dense<0.000000e+00> : vector<16x96xf32>
    %60 = tpu.matmul %59, %58, %cst_26 {dimension_numbers = #tpu.dot_dimension_numbers<[1], [0], [0], [1], [0, 0, 1, 1], [], []>} : vector<16x96xbf16>, vector<96x96xbf16>, vector<16x96xf32> -> vector<16x96xf32>
    %c5 = arith.constant 5 : index
    %c0_27 = arith.constant 0 : index
    %61 = vector.load %arg3[%c5, %c0_27] : memref<16x192xf32, #tpu.memory_space<vmem>>, vector<1x96xf32>
    %62 = vector.broadcast %61 : vector<1x96xf32> to vector<16x96xf32>
    %63 = arith.addf %60, %62 : vector<16x96xf32>
    %cst_28 = arith.constant 0.000000e+00 : f32
    %64 = vector.broadcast %cst_28 : f32 to vector<16x96xf32>
    %65 = arith.maximumf %63, %64 : vector<16x96xf32>
    %c704 = arith.constant 704 : index
    %c0_29 = arith.constant 0 : index
    %66 = vector.load %arg2[%c704, %c0_29] : memref<1616x192xbf16, #tpu.memory_space<vmem>>, vector<96x96xbf16>
    %67 = arith.truncf %65 : vector<16x96xf32> to vector<16x96xbf16>
    %cst_30 = arith.constant dense<0.000000e+00> : vector<16x96xf32>
    %68 = tpu.matmul %67, %66, %cst_30 {dimension_numbers = #tpu.dot_dimension_numbers<[1], [0], [0], [1], [0, 0, 1, 1], [], []>} : vector<16x96xbf16>, vector<96x96xbf16>, vector<16x96xf32> -> vector<16x96xf32>
    %c6 = arith.constant 6 : index
    %c0_31 = arith.constant 0 : index
    %69 = vector.load %arg3[%c6, %c0_31] : memref<16x192xf32, #tpu.memory_space<vmem>>, vector<1x96xf32>
    %70 = vector.broadcast %69 : vector<1x96xf32> to vector<16x96xf32>
    %71 = arith.addf %68, %70 : vector<16x96xf32>
    %72 = arith.addf %57, %71 : vector<16x96xf32>
    %c800 = arith.constant 800 : index
    %c0_32 = arith.constant 0 : index
    %73 = vector.load %arg2[%c800, %c0_32] : memref<1616x192xbf16, #tpu.memory_space<vmem>>, vector<96x96xbf16>
    %74 = arith.truncf %72 : vector<16x96xf32> to vector<16x96xbf16>
    %cst_33 = arith.constant dense<0.000000e+00> : vector<16x96xf32>
    %75 = tpu.matmul %74, %73, %cst_33 {dimension_numbers = #tpu.dot_dimension_numbers<[1], [0], [0], [1], [0, 0, 1, 1], [], []>} : vector<16x96xbf16>, vector<96x96xbf16>, vector<16x96xf32> -> vector<16x96xf32>
    %c7 = arith.constant 7 : index
    %c0_34 = arith.constant 0 : index
    %76 = vector.load %arg3[%c7, %c0_34] : memref<16x192xf32, #tpu.memory_space<vmem>>, vector<1x96xf32>
    %77 = vector.broadcast %76 : vector<1x96xf32> to vector<16x96xf32>
    %78 = arith.addf %75, %77 : vector<16x96xf32>
    %cst_35 = arith.constant 0.000000e+00 : f32
    %79 = vector.broadcast %cst_35 : f32 to vector<16x96xf32>
    %80 = arith.maximumf %78, %79 : vector<16x96xf32>
    %c896 = arith.constant 896 : index
    %c0_36 = arith.constant 0 : index
    %81 = vector.load %arg2[%c896, %c0_36] : memref<1616x192xbf16, #tpu.memory_space<vmem>>, vector<96x96xbf16>
    %82 = arith.truncf %80 : vector<16x96xf32> to vector<16x96xbf16>
    %cst_37 = arith.constant dense<0.000000e+00> : vector<16x96xf32>
    %83 = tpu.matmul %82, %81, %cst_37 {dimension_numbers = #tpu.dot_dimension_numbers<[1], [0], [0], [1], [0, 0, 1, 1], [], []>} : vector<16x96xbf16>, vector<96x96xbf16>, vector<16x96xf32> -> vector<16x96xf32>
    %c8 = arith.constant 8 : index
    %c0_38 = arith.constant 0 : index
    %84 = vector.load %arg3[%c8, %c0_38] : memref<16x192xf32, #tpu.memory_space<vmem>>, vector<1x96xf32>
    %85 = vector.broadcast %84 : vector<1x96xf32> to vector<16x96xf32>
    %86 = arith.addf %83, %85 : vector<16x96xf32>
    %87 = arith.addf %72, %86 : vector<16x96xf32>
    %c992 = arith.constant 992 : index
    %c0_39 = arith.constant 0 : index
    %88 = vector.load %arg2[%c992, %c0_39] : memref<1616x192xbf16, #tpu.memory_space<vmem>>, vector<96x96xbf16>
    %89 = arith.truncf %87 : vector<16x96xf32> to vector<16x96xbf16>
    %cst_40 = arith.constant dense<0.000000e+00> : vector<16x96xf32>
    %90 = tpu.matmul %89, %88, %cst_40 {dimension_numbers = #tpu.dot_dimension_numbers<[1], [0], [0], [1], [0, 0, 1, 1], [], []>} : vector<16x96xbf16>, vector<96x96xbf16>, vector<16x96xf32> -> vector<16x96xf32>
    %c9 = arith.constant 9 : index
    %c0_41 = arith.constant 0 : index
    %91 = vector.load %arg3[%c9, %c0_41] : memref<16x192xf32, #tpu.memory_space<vmem>>, vector<1x96xf32>
    %92 = vector.broadcast %91 : vector<1x96xf32> to vector<16x96xf32>
    %93 = arith.addf %90, %92 : vector<16x96xf32>
    %cst_42 = arith.constant 0.000000e+00 : f32
    %94 = vector.broadcast %cst_42 : f32 to vector<16x96xf32>
    %95 = arith.maximumf %93, %94 : vector<16x96xf32>
    %c1088 = arith.constant 1088 : index
    %c0_43 = arith.constant 0 : index
    %96 = vector.load %arg2[%c1088, %c0_43] : memref<1616x192xbf16, #tpu.memory_space<vmem>>, vector<96x96xbf16>
    %97 = arith.truncf %95 : vector<16x96xf32> to vector<16x96xbf16>
    %cst_44 = arith.constant dense<0.000000e+00> : vector<16x96xf32>
    %98 = tpu.matmul %97, %96, %cst_44 {dimension_numbers = #tpu.dot_dimension_numbers<[1], [0], [0], [1], [0, 0, 1, 1], [], []>} : vector<16x96xbf16>, vector<96x96xbf16>, vector<16x96xf32> -> vector<16x96xf32>
    %c10 = arith.constant 10 : index
    %c0_45 = arith.constant 0 : index
    %99 = vector.load %arg3[%c10, %c0_45] : memref<16x192xf32, #tpu.memory_space<vmem>>, vector<1x96xf32>
    %100 = vector.broadcast %99 : vector<1x96xf32> to vector<16x96xf32>
    %101 = arith.addf %98, %100 : vector<16x96xf32>
    %c1408 = arith.constant 1408 : index
    %c0_46 = arith.constant 0 : index
    %102 = vector.load %arg2[%c1408, %c0_46] : memref<1616x192xbf16, #tpu.memory_space<vmem>>, vector<6x16xbf16>
    %103 = arith.truncf %101 : vector<16x96xf32> to vector<16x96xbf16>
    %cst_47 = arith.constant dense<0.000000e+00> : vector<6x96xf32>
    %104 = tpu.matmul %102, %103, %cst_47 {dimension_numbers = #tpu.dot_dimension_numbers<[1], [0], [0], [1], [0, 0, 1, 1], [], []>} : vector<6x16xbf16>, vector<16x96xbf16>, vector<6x96xf32> -> vector<6x96xf32>
    %c1424 = arith.constant 1424 : index
    %c0_48 = arith.constant 0 : index
    %105 = vector.load %arg2[%c1424, %c0_48] : memref<1616x192xbf16, #tpu.memory_space<vmem>>, vector<6x96xbf16>
    %106 = arith.extf %105 : vector<6x96xbf16> to vector<6x96xf32>
    %107 = arith.mulf %104, %106 : vector<6x96xf32>
    %108 = arith.truncf %107 : vector<6x96xf32> to vector<6x96xbf16>
    %c1184 = arith.constant 1184 : index
    %c0_49 = arith.constant 0 : index
    %109 = vector.load %arg2[%c1184, %c0_49] : memref<1616x192xbf16, #tpu.memory_space<vmem>>, vector<96x96xbf16>
    %cst_50 = arith.constant dense<0.000000e+00> : vector<6x96xf32>
    %110 = tpu.matmul %108, %109, %cst_50 {dimension_numbers = #tpu.dot_dimension_numbers<[1], [0], [0], [1], [0, 0, 1, 1], [], []>} : vector<6x96xbf16>, vector<96x96xbf16>, vector<6x96xf32> -> vector<6x96xf32>
    %c11 = arith.constant 11 : index
    %c0_51 = arith.constant 0 : index
    %111 = vector.load %arg3[%c11, %c0_51] : memref<16x192xf32, #tpu.memory_space<vmem>>, vector<1x96xf32>
    %112 = vector.broadcast %111 : vector<1x96xf32> to vector<6x96xf32>
    %113 = arith.addf %110, %112 : vector<6x96xf32>
    %c1488 = arith.constant 1488 : index
    %c0_52 = arith.constant 0 : index
    %114 = vector.load %arg2[%c1488, %c0_52] : memref<1616x192xbf16, #tpu.memory_space<vmem>>, vector<18x6xbf16>
    %115 = vector.extract_strided_slice %113 {offsets = [0, 0], sizes = [6, 32], strides = [1, 1]} : vector<6x96xf32> to vector<6x32xf32>
    %116 = arith.truncf %115 : vector<6x32xf32> to vector<6x32xbf16>
    %cst_53 = arith.constant dense<0.000000e+00> : vector<18x32xf32>
    %117 = tpu.matmul %114, %116, %cst_53 {dimension_numbers = #tpu.dot_dimension_numbers<[1], [0], [0], [1], [0, 0, 1, 1], [], []>} : vector<18x6xbf16>, vector<6x32xbf16>, vector<18x32xf32> -> vector<18x32xf32>
    %c1520 = arith.constant 1520 : index
    %c0_54 = arith.constant 0 : index
    %118 = vector.load %arg2[%c1520, %c0_54] : memref<1616x192xbf16, #tpu.memory_space<vmem>>, vector<18x6xbf16>
    %119 = vector.extract_strided_slice %113 {offsets = [0, 32], sizes = [6, 64], strides = [1, 1]} : vector<6x96xf32> to vector<6x64xf32>
    %120 = arith.truncf %119 : vector<6x64xf32> to vector<6x64xbf16>
    %cst_55 = arith.constant dense<0.000000e+00> : vector<18x64xf32>
    %121 = tpu.matmul %118, %120, %cst_55 {dimension_numbers = #tpu.dot_dimension_numbers<[1], [0], [0], [1], [0, 0, 1, 1], [], []>} : vector<18x6xbf16>, vector<6x64xbf16>, vector<18x64xf32> -> vector<18x64xf32>
    %122 = vector.extract_strided_slice %121 {offsets = [0, 0], sizes = [18, 32], strides = [1, 1]} : vector<18x64xf32> to vector<18x32xf32>
    %123 = vector.extract_strided_slice %121 {offsets = [0, 32], sizes = [18, 32], strides = [1, 1]} : vector<18x64xf32> to vector<18x32xf32>
    %124 = arith.mulf %117, %122 : vector<18x32xf32>
    %125 = arith.truncf %124 : vector<18x32xf32> to vector<18x32xbf16>
    %c1440 = arith.constant 1440 : index
    %c0_56 = arith.constant 0 : index
    %126 = vector.load %arg2[%c1440, %c0_56] : memref<1616x192xbf16, #tpu.memory_space<vmem>>, vector<32x8xbf16>
    %cst_57 = arith.constant dense<0.000000e+00> : vector<18x8xf32>
    %127 = tpu.matmul %125, %126, %cst_57 {dimension_numbers = #tpu.dot_dimension_numbers<[1], [0], [0], [1], [0, 0, 1, 1], [], []>} : vector<18x32xbf16>, vector<32x8xbf16>, vector<18x8xf32> -> vector<18x8xf32>
    %cst_58 = arith.constant 5.000000e-01 : f32
    %128 = vector.broadcast %cst_58 : f32 to vector<18x8xf32>
    %129 = arith.mulf %127, %128 : vector<18x8xf32>
    %130 = vector.shape_cast %129 : vector<18x8xf32> to vector<1x18x8xf32>
    %cst_59 = arith.constant dense<0xFF800000> : vector<1xf32>
    %131 = vector.multi_reduction <maximumf>, %130, %cst_59 [1, 2] : vector<1x18x8xf32> to vector<1xf32>
    %132 = vector.shape_cast %131 : vector<1xf32> to vector<1x1x1xf32>
    %133 = vector.extract %132[0, 0, 0] : f32 from vector<1x1x1xf32>
    %134 = vector.broadcast %133 : f32 to vector<1x1xf32>
    %135 = vector.broadcast %134 : vector<1x1xf32> to vector<18x8xf32>
    %136 = arith.subf %129, %135 : vector<18x8xf32>
    %137 = math.exp %136 : vector<18x8xf32>
    %c1552 = arith.constant 1552 : index
    %c0_60 = arith.constant 0 : index
    %138 = vector.load %arg2[%c1552, %c0_60] : memref<1616x192xbf16, #tpu.memory_space<vmem>>, vector<6x18xbf16>
    %139 = arith.truncf %137 : vector<18x8xf32> to vector<18x8xbf16>
    %cst_61 = arith.constant dense<0.000000e+00> : vector<6x8xf32>
    %140 = tpu.matmul %138, %139, %cst_61 {dimension_numbers = #tpu.dot_dimension_numbers<[1], [0], [0], [1], [0, 0, 1, 1], [], []>} : vector<6x18xbf16>, vector<18x8xbf16>, vector<6x8xf32> -> vector<6x8xf32>
    %c1568 = arith.constant 1568 : index
    %c0_62 = arith.constant 0 : index
    %141 = vector.load %arg2[%c1568, %c0_62] : memref<1616x192xbf16, #tpu.memory_space<vmem>>, vector<18x6xbf16>
    %142 = arith.truncf %140 : vector<6x8xf32> to vector<6x8xbf16>
    %cst_63 = arith.constant dense<0.000000e+00> : vector<18x8xf32>
    %143 = tpu.matmul %141, %142, %cst_63 {dimension_numbers = #tpu.dot_dimension_numbers<[1], [0], [0], [1], [0, 0, 1, 1], [], []>} : vector<18x6xbf16>, vector<6x8xbf16>, vector<18x8xf32> -> vector<18x8xf32>
    %144 = tpu.reciprocal %143 {approx = true} : vector<18x8xf32> -> vector<18x8xf32>
    %145 = arith.mulf %137, %144 : vector<18x8xf32>
    %146 = arith.truncf %145 : vector<18x8xf32> to vector<18x8xbf16>
    %c1472 = arith.constant 1472 : index
    %c0_64 = arith.constant 0 : index
    %147 = vector.load %arg2[%c1472, %c0_64] : memref<1616x192xbf16, #tpu.memory_space<vmem>>, vector<8x32xbf16>
    %cst_65 = arith.constant dense<0.000000e+00> : vector<18x32xf32>
    %148 = tpu.matmul %146, %147, %cst_65 {dimension_numbers = #tpu.dot_dimension_numbers<[1], [0], [0], [1], [0, 0, 1, 1], [], []>} : vector<18x8xbf16>, vector<8x32xbf16>, vector<18x32xf32> -> vector<18x32xf32>
    %c1600 = arith.constant 1600 : index
    %c0_66 = arith.constant 0 : index
    %149 = vector.load %arg2[%c1600, %c0_66] : memref<1616x192xbf16, #tpu.memory_space<vmem>>, vector<2x18xbf16>
    %150 = arith.mulf %148, %123 : vector<18x32xf32>
    %151 = arith.truncf %150 : vector<18x32xf32> to vector<18x32xbf16>
    %cst_67 = arith.constant dense<0.000000e+00> : vector<2x32xf32>
    %152 = tpu.matmul %149, %151, %cst_67 {dimension_numbers = #tpu.dot_dimension_numbers<[1], [0], [0], [1], [0, 0, 1, 1], [], []>} : vector<2x18xbf16>, vector<18x32xbf16>, vector<2x32xf32> -> vector<2x32xf32>
    %cst_68 = arith.constant 0.333333343 : f32
    %153 = vector.broadcast %cst_68 : f32 to vector<2x32xf32>
    %154 = arith.mulf %152, %153 : vector<2x32xf32>
    %155 = arith.truncf %154 : vector<2x32xf32> to vector<2x32xbf16>
    %c1280 = arith.constant 1280 : index
    %c0_69 = arith.constant 0 : index
    %156 = vector.load %arg2[%c1280, %c0_69] : memref<1616x192xbf16, #tpu.memory_space<vmem>>, vector<32x32xbf16>
    %cst_70 = arith.constant dense<0.000000e+00> : vector<2x32xf32>
    %157 = tpu.matmul %155, %156, %cst_70 {dimension_numbers = #tpu.dot_dimension_numbers<[1], [0], [0], [1], [0, 0, 1, 1], [], []>} : vector<2x32xbf16>, vector<32x32xbf16>, vector<2x32xf32> -> vector<2x32xf32>
    %c12 = arith.constant 12 : index
    %c0_71 = arith.constant 0 : index
    %158 = vector.load %arg3[%c12, %c0_71] : memref<16x192xf32, #tpu.memory_space<vmem>>, vector<1x32xf32>
    %159 = vector.broadcast %158 : vector<1x32xf32> to vector<2x32xf32>
    %160 = arith.addf %157, %159 : vector<2x32xf32>
    %161 = arith.truncf %160 : vector<2x32xf32> to vector<2x32xbf16>
    %c1312 = arith.constant 1312 : index
    %c0_72 = arith.constant 0 : index
    %162 = vector.load %arg2[%c1312, %c0_72] : memref<1616x192xbf16, #tpu.memory_space<vmem>>, vector<32x64xbf16>
    %cst_73 = arith.constant dense<0.000000e+00> : vector<2x64xf32>
    %163 = tpu.matmul %161, %162, %cst_73 {dimension_numbers = #tpu.dot_dimension_numbers<[1], [0], [0], [1], [0, 0, 1, 1], [], []>} : vector<2x32xbf16>, vector<32x64xbf16>, vector<2x64xf32> -> vector<2x64xf32>
    %c13 = arith.constant 13 : index
    %c0_74 = arith.constant 0 : index
    %164 = vector.load %arg3[%c13, %c0_74] : memref<16x192xf32, #tpu.memory_space<vmem>>, vector<1x64xf32>
    %165 = vector.broadcast %164 : vector<1x64xf32> to vector<2x64xf32>
    %166 = arith.addf %163, %165 : vector<2x64xf32>
    %cst_75 = arith.constant 0.000000e+00 : f32
    %167 = vector.broadcast %cst_75 : f32 to vector<2x64xf32>
    %168 = arith.maximumf %166, %167 : vector<2x64xf32>
    %169 = arith.truncf %168 : vector<2x64xf32> to vector<2x64xbf16>
    %c1344 = arith.constant 1344 : index
    %c0_76 = arith.constant 0 : index
    %170 = vector.load %arg2[%c1344, %c0_76] : memref<1616x192xbf16, #tpu.memory_space<vmem>>, vector<64x128xbf16>
    %cst_77 = arith.constant dense<0.000000e+00> : vector<2x128xf32>
    %171 = tpu.matmul %169, %170, %cst_77 {dimension_numbers = #tpu.dot_dimension_numbers<[1], [0], [0], [1], [0, 0, 1, 1], [], []>} : vector<2x64xbf16>, vector<64x128xbf16>, vector<2x128xf32> -> vector<2x128xf32>
    %c14 = arith.constant 14 : index
    %c0_78 = arith.constant 0 : index
    %172 = vector.load %arg3[%c14, %c0_78] : memref<16x192xf32, #tpu.memory_space<vmem>>, vector<1x128xf32>
    %173 = vector.broadcast %172 : vector<1x128xf32> to vector<2x128xf32>
    %174 = arith.addf %171, %173 : vector<2x128xf32>
    %c0_79 = arith.constant 0 : index
    %c0_80 = arith.constant 0 : index
    %175 = vector.load %arg4[%c0_79, %c0_80] : memref<2x128xf32, #tpu.memory_space<vmem>>, vector<2x128xf32>
    tpu.vector_store %arg4[%c0_79, %c0_80], %174 {strides = array<i32>} : memref<2x128xf32, #tpu.memory_space<vmem>>, vector<2x128xf32>,
    return
  }
}

</mosaic_0001>

<bundles_post_ra>
// kernel: fused_forward.1
= control target key start
LH: loop header
LB: loop body
LE: loop exit
PB: predicated region body
PF: predicated region fallthrough
CT: control target
= control target key end

     0   :  { %v2763_v1 = vmov 0   ;;  %v2764_v2 = vmov 0.0   ;;  %vm2765_vm0 = vmmov 0   ;;  %vm253_vm1 = vcmask 1043456   ;;  %s3364_s0 = inlined_call_operand.vmem [shape: f32[16,208], index: 0, kind: input, shape index: {}]   ;;  %s3365_s1 = inlined_call_operand.vmem [shape: s32[16,1], index: 1, kind: input, shape index: {}]   ;;  %s3366_s2 = inlined_call_operand.vmem [shape: bf16[1616,192], index: 2, kind: input, shape index: {}]   ;;  %s3367_s3 = inlined_call_operand.vmem [shape: f32[16,192], index: 3, kind: input, shape index: {}]   ;;  %s3368_s4 = inlined_call_operand.hbm [shape: f32[2,128], index: 4, kind: output, shape index: {}]  }
   0x1   :  { %v179_v0 = vld [vmem:[%s3365_s1] sm:$0xff]  ;;  %2597 = vset.pattern.permute.xlu0 %v2763_v1  ;;  %2340 = vmatprep.subr.bf16.mxu1 %v2764_v2  ;;  %v2603_v3 = vld [vmem:[%s3366_s2 + $0xd0] ss:$8 sps:$4 sm:$0xff]   ;;  %v180_v4 = vld [vmem:[%s3365_s1 + $0x8] sm:$0xff]  ;;  %vm130_vm2 = vcmask 654336  }
   0x2   :  { %184 = vperm.xlu0 %2597, %v179_v0   ;;  %134 = vmatprep.subr.bf16.mxu0 %v2763_v1  ;;  %v2604_v5 = vld [vmem:[%s3366_s2 + $0xe0] ss:$8 sps:$4 sm:$0xff]   ;;  %v2605_v6 = vld [vmem:[%s3366_s2 + $0xf0] ss:$8 sps:$4 sm:$0xff]  }
   0x3   :  { %2341 = vmatpush3.bf16.msra.mxu1 %v2603_v3  ;;  %2354 = vmatprep.mubr.msk.bf16.mxu1 %vm2765_vm0, %v2764_v2  ;;  %v2610_v7 = vld [vmem:[%s3366_s2] ss:$8 sps:$4 sm:$0xff]   ;;  %v2611_v9 = vld [vmem:[%s3366_s2 + $0x10] ss:$8 sps:$4 sm:$0xff]  }
   0x4   :  { %2342 = vmatprep.subr.bf16.mxu1 %v2764_v2  ;;  %v2606_v8 = vld [vmem:[%s3366_s2 + $0x100] ss:$8 sps:$4 sm:$0xff]   ;;  %135 = vmatpush1.bf16.msra.mxu0 %v2610_v7  ;;  %v2607_v10 = vld [vmem:[%s3366_s2 + $0x110] ss:$8 sps:$4 sm:$0xff]  }
   0x5   :  { %136 = vmatprep.subr.bf16.mxu0 %v2763_v1  ;;  %v2612_v11 = vld [vmem:[%s3366_s2 + $0x20] ss:$8 sps:$4 sm:$0xff]   ;;  %v2609_v13 = vld [vmem:[%s3366_s2 + $0x130] ss:$0 sps:$4 sm:$0xff]   ;;  %v22_v16 = vld [vmem:[%s3364_s0 + $0x18] sm:$0xff] }
   0x6   :  { %187 = vperm.xlu0 %2597, %v180_v4   ;;  %v2608_v12 = vld [vmem:[%s3366_s2 + $0x120] ss:$8 sps:$4 sm:$0xff]   ;;  %v2613_v14 = vld [vmem:[%s3366_s2 + $0x30] ss:$8 sps:$4 sm:$0xff]   ;;  %v255_v19 = vsel %vm253_vm1, %v2609_v13, 0 }
   0x7   :  { %2343 = vmatpush3.bf16.msra.mxu1 %v2604_v5  ;;  %v20_v15 = vld [vmem:[%s3364_s0 + $0x8] sm:$0xff]  ;;  %v2615_v20 = vld [vmem:[%s3366_s2 + $0x50] ss:$8 sps:$4 sm:$0xff]   ;;  %v19_v28 = vld [vmem:[%s3364_s0] sm:$0xff] }
   0x8   :  { %2344 = vmatprep.subr.bf16.mxu1 %v2764_v2  ;;  %137 = vmatpush1.bf16.msra.mxu0 %v2611_v9  ;;  %v2614_v17 = vld [vmem:[%s3366_s2 + $0x40] ss:$8 sps:$4 sm:$0xff]   ;;  %v24_v18 = vpack.c.bf16 %v22_v16, %v20_v15  ;;  %v2617_v22 = vld [vmem:[%s3366_s2 + $0x70] ss:$8 sps:$4 sm:$0xff]  }
   0x9   :  { %138 = vmatprep.subr.bf16.mxu0 %v2763_v1  ;;  %v2616_v21 = vld [vmem:[%s3366_s2 + $0x60] ss:$8 sps:$4 sm:$0xff]   ;;  %v2619_v24 = vld [vmem:[%s3366_s2 + $0x90] ss:$8 sps:$4 sm:$0xff]  }
   0xa   :  { %2114 = vmatprep.mubr.msk.bf16.mxu0 %vm130_vm2, %v24_v18  ;;  %v2618_v23 = vld [vmem:[%s3366_s2 + $0x80] ss:$8 sps:$4 sm:$0xff]   ;;  %v2621_v26 = vld [vmem:[%s3366_s2 + $0xb0] ss:$8 sps:$4 sm:$0xff]  }
   0xb   :  { %2345 = vmatpush3.bf16.msra.mxu1 %v2605_v6  ;;  %v2620_v25 = vld [vmem:[%s3366_s2 + $0xa0] ss:$8 sps:$4 sm:$0xff]   ;;  %v21_v29 = vld [vmem:[%s3364_s0 + $0x10] sm:$0xff] }
   0xc   :  { %2346 = vmatprep.subr.bf16.mxu1 %v2764_v2  ;;  %139 = vmatpush1.bf16.msra.mxu0 %v2612_v11  ;;  %v2622_v27 = vld [vmem:[%s3366_s2 + $0xc0] ss:$8 sps:$4 sm:$0xff]   ;;  %v23_v30 = vpack.c.bf16 %v21_v29, %v19_v28 }
   0xd   :  { %140 = vmatprep.subr.bf16.mxu0 %v2763_v1 }
   0xf   :  { %2347 = vmatpush3.bf16.msra.mxu1 %v2606_v8 }
  0x10   :  { %2348 = vmatprep.subr.bf16.mxu1 %v2764_v2  ;;  %141 = vmatpush1.bf16.msra.mxu0 %v2613_v14 }
  0x11   :  { %142 = vmatprep.subr.bf16.mxu0 %v2763_v1 }
  0x13   :  { %2349 = vmatpush3.bf16.msra.mxu1 %v2607_v10 }
  0x14   :  { %2350 = vmatprep.subr.bf16.mxu1 %v2764_v2  ;;  %143 = vmatpush1.bf16.msra.mxu0 %v2614_v17 }
  0x15   :  { %144 = vmatprep.subr.bf16.mxu0 %v2763_v1 }
  0x17   :  { %2351 = vmatpush3.bf16.msra.mxu1 %v2608_v12 }
  0x18   :  { %2352 = vmatprep.subr.bf16.mxu1 %v2764_v2  ;;  %145 = vmatpush1.bf16.msra.mxu0 %v2615_v20 }
  0x19   :  { %146 = vmatprep.subr.bf16.mxu0 %v2763_v1 }
  0x1b   :  { %2353 = vmatpush3.bf16.msra.mxu1 %v255_v19 }
  0x1c   :  { %147 = vmatpush1.bf16.msra.mxu0 %v2616_v21 }
  0x1d   :  { %148 = vmatprep.subr.bf16.mxu0 %v2763_v1 }
  0x20   :  { %149 = vmatpush1.bf16.msra.mxu0 %v2617_v22 }
  0x21   :  { %150 = vmatprep.subr.bf16.mxu0 %v2763_v1 }
  0x24   :  { %151 = vmatpush1.bf16.msra.mxu0 %v2618_v23 }
  0x25   :  { %152 = vmatprep.subr.bf16.mxu0 %v2763_v1 }
  0x28   :  { %153 = vmatpush1.bf16.msra.mxu0 %v2619_v24 }
  0x29   :  { %154 = vmatprep.subr.bf16.mxu0 %v2763_v1 }
  0x2c   :  { %155 = vmatpush1.bf16.msra.mxu0 %v2620_v25 }
  0x2d   :  { %156 = vmatprep.subr.bf16.mxu0 %v2763_v1 }
  0x30   :  { %157 = vmatpush1.bf16.msra.mxu0 %v2621_v26 }
  0x31   :  { %158 = vmatprep.subr.bf16.mxu0 %v2763_v1 }
  0x34   :  { %159 = vmatpush1.bf16.msra.mxu0 %v2622_v27 }
  0x35   :  { %2358 = vmatprep.subr.bf16.mxu0 %v2764_v2 }
  0x37   :  { %167 = vmatmul.mubr.bf16.vlgmr.msra.gmra.mrb[0].mxu0 %v23_v30 }
  0x38   :  { %2370 = vmatprep.mubr.msk.bf16.mxu0 %vm2765_vm0, %v2764_v2 }
  0x39   :  { %9 = vsyncpa [#allocation3], 0  ;;  %v181_v31 = vlaneseq  ;;  %vm249_vm5 = vcmask 850944   ;;  %v2623_v38 = vld [vmem:[%s3366_s2 + $0x140] ss:$8 sps:$4 sm:$0xff]   ;;  %s2766_s11 = smov 64  }
  0x3a   :  { %v2625_v39 = vld [vmem:[%s3366_s2 + $0x144] ss:$8 sps:$4 sm:$0xff]   ;;  %v2628_v40 = vld [vmem:[%s3366_s2 + $0x154] ss:$8 sps:$4 sm:$0xff]   ;;  %v2626_v41 = vld [vmem:[%s3366_s2 + $0x150] ss:$8 sps:$4 sm:$0xff]  }
  0x3b   :  { %v182_v32 = vand.u32 127, %v181_v31  ;;  %404 = vmatprep.subr.bf16.mxu1 %v2625_v39  ;;  %v2631_v42 = vld [vmem:[%s3366_s2 + $0x164] ss:$8 sps:$4 sm:$0xff]   ;;  %v2629_v43 = vld [vmem:[%s3366_s2 + $0x160] ss:$8 sps:$4 sm:$0xff]   ;;  %vm308_vm6 = vcmask 261120  }
  0x3c   :  { %v2634_v44 = vld [vmem:[%s3366_s2 + $0x174] ss:$8 sps:$4 sm:$0xff]   ;;  %v2632_v45 = vld [vmem:[%s3366_s2 + $0x170] ss:$8 sps:$4 sm:$0xff]   ;;  %v2637_v46 = vld [vmem:[%s3366_s2 + $0x184] ss:$8 sps:$4 sm:$0xff]  }
  0x3d   :  { %v2635_v47 = vld [vmem:[%s3366_s2 + $0x180] ss:$8 sps:$4 sm:$0xff]   ;;  %v2640_v59 = vld [vmem:[%s3366_s2 + $0x194] ss:$8 sps:$4 sm:$0xff]   ;;  %v2638_v60 = vld [vmem:[%s3366_s2 + $0x190] ss:$8 sps:$4 sm:$0xff]  }
  0x3e   :  { %v209_v52 = vld [vmem:[%s3367_s3 + $0x1] ss:$0 sm:$0xff]  ;;  %v51_v0 = vld [vmem:[%s3367_s3] ss:$0 sm:$0xff]  ;;  %vm311_vm7 = vcmask 523264   ;;  %vm400_vm8 = vcmask 785408  }
  0x3f   :  { %v2641_v16 = vld [vmem:[%s3366_s2 + $0x1a0] ss:$8 sps:$4 sm:$0xff]   ;;  %v2642_v17 = vld [vmem:[%s3366_s2 + $0x1b0] ss:$8 sps:$4 sm:$0xff]   ;;  %v331_v20 = vshrl.u32 %v181_v31, 7  ;;  %s2767_s30 = smov 32  }
  0x40   :  { %2359 = vmatpush3.bf16.msra.mxu0 %v2641_v16  ;;  %v2643_v18 = vld [vmem:[%s3366_s2 + $0x1c0] ss:$8 sps:$4 sm:$0xff]   ;;  %v2644_v19 = vld [vmem:[%s3366_s2 + $0x1d0] ss:$8 sps:$4 sm:$0xff]   ;;  %vm1249_vm9 = vcmask 130048   ;;  %vm1401_vm10 = vcmask 48128  }
  0x41   :  { %2360 = vmatprep.subr.bf16.mxu0 %v2764_v2  ;;  %v332_v21 = vsub.s32 0, %v331_v20  ;;  %v2125_v22 = vld [vmem:[%s3367_s3 + $0x2] ss:$8 sm:$0x3]  ;;  %v336_v23 = vsub.s32 1, %v331_v20  ;;  %vm1408_vm11 = vcmask 1042432  }
  0x42   :  { %v2646_v39 = vld [vmem:[%s3366_s2 + $0x1f0] ss:$8 sps:$4 sm:$0xff]   ;;  %v2657_v20 = vld [vmem:[%s3366_s2 + $0x2a0] ss:$8 sps:$4 sm:$0xff]   ;;  %s2768_s9 = smov 96   ;;  %vm1609_vm12 = vcmask 64512  }
  0x43   :  { %v333_v24 = vrot.slane %v2125_v22, %v332_v21  ;;  %v337_v25 = vrot.slane %v2125_v22, %v336_v23  ;;  %v2658_v21 = vld [vmem:[%s3366_s2 + $0x2b0] ss:$8 sps:$4 sm:$0xff]   ;;  %v2659_v22 = vld [vmem:[%s3366_s2 + $0x2c0] ss:$8 sps:$4 sm:$0xff]   ;;  %vm1612_vm13 = vcmask 58368   ;;  %vm1642_vm14 = vcmask 1040384  }
  0x44   :  { %2361 = vmatpush3.bf16.msra.mxu0 %v2642_v17  ;;  %v2660_v23 = vld [vmem:[%s3366_s2 + $0x2d0] ss:$8 sps:$4 sm:$0xff]   ;;  %vm1638_vm15 = vcmask 146432   ;;  %s2769_s24 = smov [#allocation2]  }
  0x45   :  { %2362 = vmatprep.subr.bf16.mxu0 %v2764_v2 }
  0x48   :  { %2363 = vmatpush3.bf16.msra.mxu0 %v2643_v18 }
  0x49   :  { %2364 = vmatprep.subr.bf16.mxu0 %v2764_v2 }
  0x4c   :  { %2365 = vmatpush3.bf16.msra.mxu0 %v2644_v19 }
  0x4d   :  { %2366 = vmatprep.subr.bf16.mxu0 %v2764_v2 }
  0x81   :  { %v185_v33 = vpop.permute.xlu0 %184 }
  0x82   :  { %vm189_vm3 = vcmp.eq.s32.totalorder %v182_v32, %v185_v33 }
  0x83   :  { %v2115_v35 = vsel %vm189_vm3, 1.0, %v2764_v2 }
  0x85   :  { %v188_v34 = vpop.permute.xlu0 %187 }
  0x86   :  { %vm190_vm4 = vcmp.eq.s32.totalorder %v182_v32, %v188_v34 }
  0x87   :  { %v2116_v36 = vsel %vm190_vm4, 1.0, %v2764_v2 }
  0x88   :  { %v195_v37 = vpack.c.bf16 %v2116_v36, %v2115_v35 }
  0x8a   :  { %2355 = vmatmul.mubr.msk.bf16.vlgmr.msra.gmra.mrb[0].mxu1 %vm249_vm5, %v195_v37 }
  0x8b   :  { %436 = vmatprep.mubr.bf16.mxu1 %v2763_v1  ;;  %405 = vmatpush1.bf16.msra.mxu1 %v2623_v38  ;;  %v2645_v38 = vld [vmem:[%s3366_s2 + $0x1e0] ss:$8 sps:$4 sm:$0xff]  }
  0x8c   :  { %406 = vmatprep.subr.bf16.mxu1 %v2628_v40  ;;  %2367 = vmatpush3.bf16.msra.mxu0 %v2645_v38  ;;  %v2667_v38 = vld [vmem:[%s3366_s2 + $0x340] ss:$8 sps:$4 sm:$0xff]  }
  0x8d   :  { %2368 = vmatprep.subr.bf16.mxu0 %v2764_v2 }
  0x8f   :  { %407 = vmatpush1.bf16.msra.mxu1 %v2626_v41 }
  0x90   :  { %408 = vmatprep.subr.bf16.mxu1 %v2631_v42  ;;  %2369 = vmatpush3.bf16.msra.mxu0 %v2646_v39  ;;  %v2668_v39 = vld [vmem:[%s3366_s2 + $0x350] ss:$8 sps:$4 sm:$0xff]  }
  0x91   :  { %2390 = vmatprep.subr.bf16.mxu0 %v2764_v2 }
  0x93   :  { %409 = vmatpush1.bf16.msra.mxu1 %v2629_v43 }
  0x94   :  { %410 = vmatprep.subr.bf16.mxu1 %v2634_v44 }
  0x97   :  { %411 = vmatpush1.bf16.msra.mxu1 %v2632_v45  ;;  %v2647_v45 = vld [vmem:[%s3366_s2 + $0x200] ss:$8 sps:$4 sm:$0xff]  }
  0x98   :  { %412 = vmatprep.subr.bf16.mxu1 %v2637_v46 }
  0x9b   :  { %413 = vmatpush1.bf16.msra.mxu1 %v2635_v47 }
  0x9c   :  { %414 = vmatprep.subr.bf16.mxu1 %v2640_v59 }
  0x9f   :  { %415 = vmatpush1.bf16.msra.mxu1 %v2638_v60 }
  0xa0   :  { %2374 = vmatprep.subr.bf16.mxu1 %v2764_v2 }
 0x10a   :  { %v168_v48 = vpop.f32.mrb[0].mxu0 }
 0x10b   :  { %v170_v49 = vpop.f32.mrb[1].mxu0  ;;  %v169_v1 = vadd.f32 %v168_v48, %v51_v0 }
 0x10c   :  { %v171_v50 = vpop.f32.mrb[2].mxu0 }
 0x10d   :  { %v173_v51 = vpop.f32.mrb[3].mxu0  ;;  %v172_v3 = vadd.f32 %v171_v50, %v51_v0  ;;  %v177_v5 = vmax.f32 %v169_v1, 0.0 }
 0x10e   :  { %v2648_v51 = vld [vmem:[%s3366_s2 + $0x210] ss:$8 sps:$4 sm:$0xff]  }
 0x10f   :  { %v178_v6 = vmax.f32 %v172_v3, 0.0 }
 0x15d   :  { %v291_v53 = vpop.f32.mrb[0].mxu1 }
 0x15e   :  { %v292_v54 = vadd.f32 %v291_v53, %v209_v52  ;;  %v2356_v55 = vpop.f32.mrb[1].mxu1 }
 0x15f   :  { %v294_v56 = vpop.f32.mrb[2].mxu1  ;;  %v2650_v55 = vld [vmem:[%s3366_s2 + $0x230] ss:$8 sps:$4 sm:$0xff]  }
 0x160   :  { %v295_v57 = vadd.f32 %v294_v56, %v209_v52  ;;  %v2357_v58 = vpop.f32.mrb[3].mxu1  ;;  %2711 = vtanh.f32 %v292_v54  ;;  %v2649_v54 = vld [vmem:[%s3366_s2 + $0x220] ss:$8 sps:$4 sm:$0xff]  }
 0x162   :  { %2713 = vtanh.f32 %v295_v57 }
 0x163   :  { %2715 = vtanh.f32 %v169_v1 }
 0x164   :  { %2717 = vtanh.f32 %v172_v3 }
 0x16a   :  { %v2712_v61 = vpop.eup %2711 }
 0x16c   :  { %v2714_v62 = vpop.eup %2713 }
 0x16d   :  { %v2598_v63 = vpack.i.bf16 %v2714_v62, %v2712_v61  ;;  %v2716_v4 = vpop.eup %2715 }
 0x16e   :  { %v2718_v7 = vpop.eup %2717  ;;  %v309_v11 = vsel %vm308_vm6, %v2716_v4, %v177_v5  ;;  %v2651_v4 = vld [vmem:[%s3366_s2 + $0x240] ss:$8 sps:$4 sm:$0xff]   ;;  %v2652_v5 = vld [vmem:[%s3366_s2 + $0x250] ss:$8 sps:$4 sm:$0xff]  }
 0x16f   :  { %2599 = vrot.lane.b32.xlu1 %v2598_v63, %s2766_s11  ;;  %v310_v12 = vsel %vm308_vm6, %v2718_v7, %v178_v6  ;;  %v2653_v6 = vld [vmem:[%s3366_s2 + $0x260] ss:$8 sps:$4 sm:$0xff]   ;;  %v2654_v7 = vld [vmem:[%s3366_s2 + $0x270] ss:$8 sps:$4 sm:$0xff]  }
 0x1e1   :  { %v2600_v8 = vpop.permute.xlu1 %2599 }
 0x1e2   :  { %v2602_v9 = vunpack.i.h.bf16 %v2600_v8  ;;  %v2601_v10 = vunpack.i.l.bf16 %v2600_v8  ;;  %v2655_v8 = vld [vmem:[%s3366_s2 + $0x280] ss:$8 sps:$4 sm:$0xff]  }
 0x1e4   :  { %v312_v13 = vsel %vm311_vm7, %v309_v11, %v2601_v10  ;;  %v313_v14 = vsel %vm311_vm7, %v310_v12, %v2602_v9  ;;  %v2656_v9 = vld [vmem:[%s3366_s2 + $0x290] ss:$8 sps:$4 sm:$0xff]   ;;  %v496_v10 = vld [vmem:[%s3367_s3 + $0x3] ss:$0 sm:$0xff] }
 0x1e5   :  { %v314_v15 = vpack.c.bf16 %v313_v14, %v312_v13 }
 0x1e7   :  { %2138 = vmatmul.mubr.msk.bf16.vlgmr.msra.gmra.mrb[4].mxu1 %vm400_vm8, %v314_v15 }
 0x1e8   :  { %2386 = vmatprep.mubr.msk.bf16.mxu1 %vm2765_vm0, %v2764_v2  ;;  %2375 = vmatpush3.bf16.msra.mxu1 %v2647_v45 }
 0x1e9   :  { %2376 = vmatprep.subr.bf16.mxu1 %v2764_v2 }
 0x1ec   :  { %2377 = vmatpush3.bf16.msra.mxu1 %v2648_v51  ;;  %v2670_v51 = vld [vmem:[%s3366_s2 + $0x370] ss:$8 sps:$4 sm:$0xff]  }
 0x1ed   :  { %2378 = vmatprep.subr.bf16.mxu1 %v2764_v2 }
 0x1f0   :  { %2379 = vmatpush3.bf16.msra.mxu1 %v2649_v54  ;;  %v2673_v54 = vld [vmem:[%s3366_s2 + $0x3a0] ss:$8 sps:$4 sm:$0xff]  }
 0x1f1   :  { %2380 = vmatprep.subr.bf16.mxu1 %v2764_v2 }
 0x1f4   :  { %2381 = vmatpush3.bf16.msra.mxu1 %v2650_v55  ;;  %v2674_v55 = vld [vmem:[%s3366_s2 + $0x3b0] ss:$8 sps:$4 sm:$0xff]  }
 0x1f5   :  { %2382 = vmatprep.subr.bf16.mxu1 %v2764_v2 }
 0x1f8   :  { %2383 = vmatpush3.bf16.msra.mxu1 %v2651_v4  ;;  %v2676_v4 = vld [vmem:[%s3366_s2 + $0x3d0] ss:$8 sps:$4 sm:$0xff]  }
 0x1f9   :  { %2384 = vmatprep.subr.bf16.mxu1 %v2764_v2 }
 0x1fc   :  { %2385 = vmatpush3.bf16.msra.mxu1 %v2652_v5  ;;  %v2677_v5 = vld [vmem:[%s3366_s2 + $0x3e0] ss:$8 sps:$4 sm:$0xff]  }
 0x1fd   :  { %2406 = vmatprep.subr.bf16.mxu1 %v2764_v2 }
 0x2ba   :  { %v438_v26 = vpop.f32.mrb[4].mxu1 }
 0x2bb   :  { %v439_v27 = vadd.f32 %v438_v26, %v333_v24  ;;  %v440_v28 = vpop.f32.mrb[5].mxu1  ;;  %v592_v26 = vld [vmem:[%s3367_s3 + $0x4] ss:$0 sm:$0xff] }
 0x2bc   :  { %v441_v29 = vadd.f32 %v440_v28, %v337_v25  ;;  %v442_v30 = vpop.f32.mrb[6].mxu1 }
 0x2bd   :  { %v449_v32 = vmul.f32 0.5, %v439_v27  ;;  %v443_v33 = vadd.f32 %v442_v30, %v333_v24  ;;  %v444_v34 = vpop.f32.mrb[7].mxu1  ;;  %v447_v60 = vmax.f32 %v439_v27, 0.0  ;;  %v2661_v24 = vld [vmem:[%s3366_s2 + $0x2e0] ss:$8 sps:$4 sm:$0xff]  }
 0x2be   :  { %v450_v35 = vmul.f32 0.5, %v441_v29  ;;  %v445_v36 = vadd.f32 %v444_v34, %v337_v25  ;;  %v2662_v25 = vld [vmem:[%s3366_s2 + $0x2f0] ss:$8 sps:$4 sm:$0xff]  }
 0x2bf   :  { %2719 = vtanh.f32 %v449_v32  ;;  %v451_v31 = vmul.f32 0.5, %v443_v33  ;;  %v448_v61 = vmax.f32 %v443_v33, 0.0 }
 0x2c0   :  { %2721 = vtanh.f32 %v450_v35  ;;  %v452_v37 = vmul.f32 0.5, %v445_v36  ;;  %v2663_v35 = vld [vmem:[%s3366_s2 + $0x300] ss:$8 sps:$4 sm:$0xff]   ;;  %v2664_v36 = vld [vmem:[%s3366_s2 + $0x310] ss:$8 sps:$4 sm:$0xff]  }
 0x2c1   :  { %2723 = vtanh.f32 %v451_v31  ;;  %v2665_v31 = vld [vmem:[%s3366_s2 + $0x320] ss:$8 sps:$4 sm:$0xff]  }
 0x2c2   :  { %2725 = vtanh.f32 %v452_v37  ;;  %v2666_v37 = vld [vmem:[%s3366_s2 + $0x330] ss:$8 sps:$4 sm:$0xff]  }
 0x2c9   :  { %v2720_v40 = vpop.eup %2719 }
 0x2ca   :  { %v2722_v41 = vpop.eup %2721  ;;  %v457_v42 = vadd.f32 1.0, %v2720_v40  ;;  %v686_v40 = vld [vmem:[%s3367_s3 + $0x5] ss:$0 sm:$0xff] }
 0x2cb   :  { %v2724_v43 = vpop.eup %2723  ;;  %v458_v44 = vadd.f32 1.0, %v2722_v41 }
 0x2cc   :  { %v2726_v46 = vpop.eup %2725  ;;  %v461_v47 = vmul.f32 0.5, %v457_v42  ;;  %v459_v48 = vadd.f32 1.0, %v2724_v43 }
 0x2cd   :  { %v460_v49 = vadd.f32 1.0, %v2726_v46  ;;  %v462_v50 = vmul.f32 0.5, %v458_v44 }
 0x2ce   :  { %469 = vrot.lane.b32.xlu1 %v461_v47, %s2767_s30  ;;  %v463_v52 = vmul.f32 0.5, %v459_v48 }
 0x2cf   :  { %471 = vrot.lane.b32.xlu0 %v462_v50, %s2767_s30  ;;  %v464_v53 = vmul.f32 0.5, %v460_v49  ;;  %v2669_v50 = vld [vmem:[%s3366_s2 + $0x360] ss:$8 sps:$4 sm:$0xff]  }
 0x2d2   :  { %473 = vrot.lane.b32.xlu1 %v463_v52, %s2767_s30  ;;  %v2671_v52 = vld [vmem:[%s3366_s2 + $0x380] ss:$8 sps:$4 sm:$0xff]  }
 0x2d3   :  { %475 = vrot.lane.b32.xlu0 %v464_v53, %s2767_s30  ;;  %v2672_v53 = vld [vmem:[%s3366_s2 + $0x390] ss:$8 sps:$4 sm:$0xff]  }
 0x340   :  { %v470_v56 = vpop.permute.xlu1 %469 }
 0x341   :  { %v472_v57 = vpop.permute.xlu0 %471 }
 0x342   :  { %v477_v58 = vsel %vm308_vm6, %v470_v56, %v472_v57  ;;  %v782_v56 = vld [vmem:[%s3367_s3 + $0x6] ss:$0 sm:$0xff] }
 0x343   :  { %v481_v0 = vmul.f32 %v477_v58, %v447_v60 }
 0x344   :  { %v474_v59 = vpop.permute.xlu1 %473 }
 0x345   :  { %v476_v62 = vpop.permute.xlu0 %475 }
 0x346   :  { %v478_v63 = vsel %vm308_vm6, %v474_v59, %v476_v62 }
 0x347   :  { %v482_v1 = vmul.f32 %v478_v63, %v448_v61 }
 0x349   :  { %v495_v3 = vpack.c.bf16 %v482_v1, %v481_v0 }
 0x34b   :  { %2371 = vmatmul.mubr.msk.bf16.vlgmr.msra.gmra.mrb[4].mxu0 %vm400_vm8, %v495_v3  ;;  %v2675_v3 = vld [vmem:[%s3366_s2 + $0x3c0] ss:$8 sps:$4 sm:$0xff]  }
 0x34c   :  { %2402 = vmatprep.mubr.msk.bf16.mxu0 %vm2765_vm0, %v2764_v2  ;;  %2391 = vmatpush3.bf16.msra.mxu0 %v2653_v6  ;;  %v2678_v6 = vld [vmem:[%s3366_s2 + $0x3f0] ss:$8 sps:$4 sm:$0xff]  }
 0x34d   :  { %2392 = vmatprep.subr.bf16.mxu0 %v2764_v2 }
 0x350   :  { %2393 = vmatpush3.bf16.msra.mxu0 %v2654_v7  ;;  %v2679_v7 = vld [vmem:[%s3366_s2 + $0x400] ss:$8 sps:$4 sm:$0xff]  }
 0x351   :  { %2394 = vmatprep.subr.bf16.mxu0 %v2764_v2 }
 0x354   :  { %2395 = vmatpush3.bf16.msra.mxu0 %v2655_v8  ;;  %v2680_v8 = vld [vmem:[%s3366_s2 + $0x410] ss:$8 sps:$4 sm:$0xff]  }
 0x355   :  { %2396 = vmatprep.subr.bf16.mxu0 %v2764_v2 }
 0x358   :  { %2397 = vmatpush3.bf16.msra.mxu0 %v2656_v9  ;;  %v878_v9 = vld [vmem:[%s3367_s3 + $0x7] ss:$0 sm:$0xff] }
 0x359   :  { %2398 = vmatprep.subr.bf16.mxu0 %v2764_v2 }
 0x35c   :  { %2399 = vmatpush3.bf16.msra.mxu0 %v2657_v20  ;;  %v2682_v20 = vld [vmem:[%s3366_s2 + $0x430] ss:$8 sps:$4 sm:$0xff]  }
 0x35d   :  { %2400 = vmatprep.subr.bf16.mxu0 %v2764_v2 }
 0x360   :  { %2401 = vmatpush3.bf16.msra.mxu0 %v2658_v21  ;;  %v2683_v21 = vld [vmem:[%s3366_s2 + $0x440] ss:$8 sps:$4 sm:$0xff]  }
 0x361   :  { %2422 = vmatprep.subr.bf16.mxu0 %v2764_v2 }
 0x41e   :  { %v570_v11 = vpop.f32.mrb[4].mxu0 }
 0x41f   :  { %v571_v12 = vadd.f32 %v570_v11, %v496_v10  ;;  %v2372_v13 = vpop.f32.mrb[5].mxu0 }
 0x420   :  { %v573_v14 = vpop.f32.mrb[6].mxu0 }
 0x421   :  { %v574_v15 = vadd.f32 %v573_v14, %v496_v10  ;;  %v2373_v16 = vpop.f32.mrb[7].mxu0  ;;  %v577_v17 = vmax.f32 %v571_v12, 0.0 }
 0x423   :  { %v578_v18 = vmax.f32 %v574_v15, 0.0 }
 0x425   :  { %v591_v19 = vpack.c.bf16 %v578_v18, %v577_v17 }
 0x427   :  { %2387 = vmatmul.mubr.msk.bf16.vlgmr.msra.gmra.mrb[8].mxu1 %vm400_vm8, %v591_v19  ;;  %v2681_v19 = vld [vmem:[%s3366_s2 + $0x420] ss:$8 sps:$4 sm:$0xff]  }
 0x428   :  { %2418 = vmatprep.mubr.msk.bf16.mxu1 %vm2765_vm0, %v2764_v2  ;;  %2407 = vmatpush3.bf16.msra.mxu1 %v2659_v22  ;;  %v2684_v22 = vld [vmem:[%s3366_s2 + $0x450] ss:$8 sps:$4 sm:$0xff]  }
 0x429   :  { %2408 = vmatprep.subr.bf16.mxu1 %v2764_v2 }
 0x42c   :  { %2409 = vmatpush3.bf16.msra.mxu1 %v2660_v23  ;;  %v2685_v23 = vld [vmem:[%s3366_s2 + $0x460] ss:$8 sps:$4 sm:$0xff]  }
 0x42d   :  { %2410 = vmatprep.subr.bf16.mxu1 %v2764_v2 }
 0x430   :  { %2411 = vmatpush3.bf16.msra.mxu1 %v2661_v24  ;;  %v2686_v24 = vld [vmem:[%s3366_s2 + $0x470] ss:$8 sps:$4 sm:$0xff]  }
 0x431   :  { %2412 = vmatprep.subr.bf16.mxu1 %v2764_v2 }
 0x434   :  { %2413 = vmatpush3.bf16.msra.mxu1 %v2662_v25  ;;  %v974_v25 = vld [vmem:[%s3367_s3 + $0x10] ss:$0 sm:$0xff] }
 0x435   :  { %2414 = vmatprep.subr.bf16.mxu1 %v2764_v2 }
 0x438   :  { %2415 = vmatpush3.bf16.msra.mxu1 %v2663_v35 }
 0x439   :  { %2416 = vmatprep.subr.bf16.mxu1 %v2764_v2 }
 0x43c   :  { %2417 = vmatpush3.bf16.msra.mxu1 %v2664_v36  ;;  %v2687_v36 = vld [vmem:[%s3366_s2 + $0x480] ss:$8 sps:$4 sm:$0xff]  }
 0x43d   :  { %2438 = vmatprep.subr.bf16.mxu1 %v2764_v2 }
 0x4fa   :  { %v666_v27 = vpop.f32.mrb[8].mxu1 }
 0x4fb   :  { %v2388_v28 = vpop.f32.mrb[9].mxu1  ;;  %v667_v30 = vadd.f32 %v666_v27, %v592_v26 }
 0x4fc   :  { %v669_v29 = vpop.f32.mrb[10].mxu1 }
 0x4fd   :  { %v670_v32 = vadd.f32 %v669_v29, %v592_v26  ;;  %v2389_v33 = vpop.f32.mrb[11].mxu1 }
 0x4ff   :  { %v685_v34 = vpack.c.bf16 %v670_v32, %v667_v30 }
 0x501   :  { %2403 = vmatmul.mubr.msk.bf16.vlgmr.msra.gmra.mrb[8].mxu0 %vm400_vm8, %v685_v34 }
 0x502   :  { %2434 = vmatprep.mubr.msk.bf16.mxu0 %vm2765_vm0, %v2764_v2  ;;  %2423 = vmatpush3.bf16.msra.mxu0 %v2665_v31  ;;  %v2688_v31 = vld [vmem:[%s3366_s2 + $0x490] ss:$8 sps:$4 sm:$0xff]  }
 0x503   :  { %2424 = vmatprep.subr.bf16.mxu0 %v2764_v2 }
 0x506   :  { %2425 = vmatpush3.bf16.msra.mxu0 %v2666_v37  ;;  %v1070_v37 = vld [vmem:[%s3367_s3 + $0x11] ss:$0 sm:$0xff] }
 0x507   :  { %2426 = vmatprep.subr.bf16.mxu0 %v2764_v2 }
 0x50a   :  { %2427 = vmatpush3.bf16.msra.mxu0 %v2667_v38 }
 0x50b   :  { %2428 = vmatprep.subr.bf16.mxu0 %v2764_v2 }
 0x50e   :  { %2429 = vmatpush3.bf16.msra.mxu0 %v2668_v39 }
 0x50f   :  { %2430 = vmatprep.subr.bf16.mxu0 %v2764_v2 }
 0x512   :  { %2431 = vmatpush3.bf16.msra.mxu0 %v2669_v50  ;;  %v2692_v50 = vld [vmem:[%s3366_s2 + $0x4d0] ss:$8 sps:$4 sm:$0xff]  }
 0x513   :  { %2432 = vmatprep.subr.bf16.mxu0 %v2764_v2 }
 0x516   :  { %2433 = vmatpush3.bf16.msra.mxu0 %v2670_v51  ;;  %v2693_v51 = vld [vmem:[%s3366_s2 + $0x4e0] ss:$8 sps:$4 sm:$0xff]  }
 0x517   :  { %2454 = vmatprep.subr.bf16.mxu0 %v2764_v2 }
 0x5d4   :  { %v760_v41 = vpop.f32.mrb[8].mxu0 }
 0x5d5   :  { %v761_v42 = vadd.f32 %v760_v41, %v686_v40  ;;  %v2404_v43 = vpop.f32.mrb[9].mxu0 }
 0x5d6   :  { %v763_v44 = vpop.f32.mrb[10].mxu0 }
 0x5d7   :  { %v764_v45 = vadd.f32 %v763_v44, %v686_v40  ;;  %v2405_v46 = vpop.f32.mrb[11].mxu0  ;;  %v767_v47 = vmax.f32 %v761_v42, 0.0 }
 0x5d9   :  { %v768_v48 = vmax.f32 %v764_v45, 0.0 }
 0x5db   :  { %v781_v49 = vpack.c.bf16 %v768_v48, %v767_v47  ;;  %v2689_v47 = vld [vmem:[%s3366_s2 + $0x4a0] ss:$8 sps:$4 sm:$0xff]   ;;  %v2690_v48 = vld [vmem:[%s3366_s2 + $0x4b0] ss:$8 sps:$4 sm:$0xff]  }
 0x5dd   :  { %2419 = vmatmul.mubr.msk.bf16.vlgmr.msra.gmra.mrb[12].mxu1 %vm400_vm8, %v781_v49  ;;  %v2691_v49 = vld [vmem:[%s3366_s2 + $0x4c0] ss:$8 sps:$4 sm:$0xff]  }
 0x5de   :  { %2450 = vmatprep.mubr.msk.bf16.mxu1 %vm2765_vm0, %v2764_v2  ;;  %2439 = vmatpush3.bf16.msra.mxu1 %v2671_v52  ;;  %v1166_v52 = vld [vmem:[%s3367_s3 + $0x12] ss:$0 sm:$0xff] }
 0x5df   :  { %2440 = vmatprep.subr.bf16.mxu1 %v2764_v2 }
 0x5e2   :  { %2441 = vmatpush3.bf16.msra.mxu1 %v2672_v53 }
 0x5e3   :  { %2442 = vmatprep.subr.bf16.mxu1 %v2764_v2 }
 0x5e6   :  { %2443 = vmatpush3.bf16.msra.mxu1 %v2673_v54 }
 0x5e7   :  { %2444 = vmatprep.subr.bf16.mxu1 %v2764_v2 }
 0x5ea   :  { %2445 = vmatpush3.bf16.msra.mxu1 %v2674_v55 }
 0x5eb   :  { %2446 = vmatprep.subr.bf16.mxu1 %v2764_v2 }
 0x5ee   :  { %2447 = vmatpush3.bf16.msra.mxu1 %v2675_v3 }
 0x5ef   :  { %2448 = vmatprep.subr.bf16.mxu1 %v2764_v2 }
 0x5f2   :  { %2449 = vmatpush3.bf16.msra.mxu1 %v2676_v4 }
 0x5f3   :  { %2470 = vmatprep.subr.bf16.mxu1 %v2764_v2 }
 0x6b0   :  { %v856_v57 = vpop.f32.mrb[12].mxu1 }
 0x6b1   :  { %v857_v58 = vadd.f32 %v856_v57, %v782_v56  ;;  %v2420_v59 = vpop.f32.mrb[13].mxu1 }
 0x6b2   :  { %v859_v60 = vpop.f32.mrb[14].mxu1 }
 0x6b3   :  { %v860_v61 = vadd.f32 %v859_v60, %v782_v56  ;;  %v2421_v62 = vpop.f32.mrb[15].mxu1  ;;  %v863_v63 = vadd.f32 %v857_v58, %v667_v30  ;;  %v1247_v60 = vld [vmem:[%s3366_s2 + $0x580] sm:$0x7] }
 0x6b4   :  { %v1293_v62 = vld [vmem:[%s3366_s2 + $0x590] sm:$0x7] }
 0x6b5   :  { %v864_v0 = vadd.f32 %v860_v61, %v670_v32  ;;  %v2694_v61 = vld [vmem:[%s3366_s2 + $0x4f0] ss:$8 sps:$4 sm:$0xff]  }
 0x6b7   :  { %v877_v1 = vpack.c.bf16 %v864_v0, %v863_v63 }
 0x6b9   :  { %2435 = vmatmul.mubr.msk.bf16.vlgmr.msra.gmra.mrb[12].mxu0 %vm400_vm8, %v877_v1 }
 0x6ba   :  { %2466 = vmatprep.mubr.msk.bf16.mxu0 %vm2765_vm0, %v2764_v2  ;;  %2455 = vmatpush3.bf16.msra.mxu0 %v2677_v5 }
 0x6bb   :  { %2456 = vmatprep.subr.bf16.mxu0 %v2764_v2 }
 0x6be   :  { %2457 = vmatpush3.bf16.msra.mxu0 %v2678_v6 }
 0x6bf   :  { %2458 = vmatprep.subr.bf16.mxu0 %v2764_v2 }
 0x6c2   :  { %2459 = vmatpush3.bf16.msra.mxu0 %v2679_v7  ;;  %v2695_v7 = vld [vmem:[%s3366_s2 + $0x5d0] ss:$8 sps:$4 sm:$0xff]  }
 0x6c3   :  { %2460 = vmatprep.subr.bf16.mxu0 %v2764_v2 }
 0x6c6   :  { %2461 = vmatpush3.bf16.msra.mxu0 %v2680_v8  ;;  %v1309_v8 = vld [vmem:[%s3367_s3 + $0x13] ss:$0 sm:$0xff] }
 0x6c7   :  { %2462 = vmatprep.subr.bf16.mxu0 %v2764_v2 }
 0x6ca   :  { %2463 = vmatpush3.bf16.msra.mxu0 %v2681_v19 }
 0x6cb   :  { %2464 = vmatprep.subr.bf16.mxu0 %v2764_v2 }
 0x6ce   :  { %2465 = vmatpush3.bf16.msra.mxu0 %v2682_v20  ;;  %v2698_v20 = vld [vmem:[%s3366_s2 + $0x600] ss:$0 sps:$4 sm:$0x11]  }
 0x6cf   :  { %2486 = vmatprep.subr.bf16.mxu0 %v2764_v2 }
 0x78c   :  { %v952_v10 = vpop.f32.mrb[12].mxu0 }
 0x78d   :  { %v953_v11 = vadd.f32 %v952_v10, %v878_v9  ;;  %v2436_v12 = vpop.f32.mrb[13].mxu0 }
 0x78e   :  { %v955_v13 = vpop.f32.mrb[14].mxu0 }
 0x78f   :  { %v956_v14 = vadd.f32 %v955_v13, %v878_v9  ;;  %v2437_v15 = vpop.f32.mrb[15].mxu0  ;;  %v959_v16 = vmax.f32 %v953_v11, 0.0 }
 0x791   :  { %v960_v17 = vmax.f32 %v956_v14, 0.0 }
 0x793   :  { %v973_v18 = vpack.c.bf16 %v960_v17, %v959_v16  ;;  %v2696_v16 = vld [vmem:[%s3366_s2 + $0x5e0] ss:$0 sps:$4 sm:$0x11]   ;;  %v2697_v17 = vld [vmem:[%s3366_s2 + $0x5f0] ss:$8 sps:$4 sm:$0xff]  }
 0x795   :  { %2451 = vmatmul.mubr.msk.bf16.vlgmr.msra.gmra.mrb[16].mxu1 %vm400_vm8, %v973_v18 }
 0x796   :  { %2482 = vmatprep.mubr.msk.bf16.mxu1 %vm2765_vm0, %v2764_v2  ;;  %2471 = vmatpush3.bf16.msra.mxu1 %v2683_v21  ;;  %v2699_v21 = vld [vmem:[%s3366_s2 + $0x5a0] ss:$8 sps:$4 sm:$0xff]  }
 0x797   :  { %2472 = vmatprep.subr.bf16.mxu1 %v2764_v2 }
 0x79a   :  { %2473 = vmatpush3.bf16.msra.mxu1 %v2684_v22  ;;  %v2700_v22 = vld [vmem:[%s3366_s2 + $0x5b0] ss:$8 sps:$4 sm:$0xff]  }
 0x79b   :  { %2474 = vmatprep.subr.bf16.mxu1 %v2764_v2 }
 0x79e   :  { %2475 = vmatpush3.bf16.msra.mxu1 %v2685_v23 }
 0x79f   :  { %2476 = vmatprep.subr.bf16.mxu1 %v2764_v2 }
 0x7a2   :  { %2477 = vmatpush3.bf16.msra.mxu1 %v2686_v24 }
 0x7a3   :  { %2478 = vmatprep.subr.bf16.mxu1 %v2764_v2 }
 0x7a6   :  { %2479 = vmatpush3.bf16.msra.mxu1 %v2687_v36 }
 0x7a7   :  { %2480 = vmatprep.subr.bf16.mxu1 %v2764_v2 }
 0x7aa   :  { %2481 = vmatpush3.bf16.msra.mxu1 %v2688_v31 }
 0x7ab   :  { %2492 = vmatprep.subr.bf16.mxu1 %v2764_v2 }
 0x868   :  { %v1048_v26 = vpop.f32.mrb[16].mxu1 }
 0x869   :  { %v1049_v27 = vadd.f32 %v1048_v26, %v974_v25  ;;  %v2452_v28 = vpop.f32.mrb[17].mxu1 }
 0x86a   :  { %v1051_v29 = vpop.f32.mrb[18].mxu1 }
 0x86b   :  { %v1052_v30 = vadd.f32 %v1051_v29, %v974_v25  ;;  %v2453_v32 = vpop.f32.mrb[19].mxu1  ;;  %v1055_v33 = vadd.f32 %v1049_v27, %v863_v63  ;;  %v1294_v63 = vunpack.c.l.bf16 %v1293_v62 }
 0x86d   :  { %v1056_v34 = vadd.f32 %v1052_v30, %v864_v0 }
 0x86f   :  { %v1069_v35 = vpack.c.bf16 %v1056_v34, %v1055_v33 }
 0x871   :  { %2467 = vmatmul.mubr.msk.bf16.vlgmr.msra.gmra.mrb[16].mxu0 %vm400_vm8, %v1069_v35 }
 0x872   :  { %2488 = vmatprep.mubr.msk.bf16.mxu0 %vm2765_vm0, %v2764_v2 }
 0x944   :  { %v1144_v38 = vpop.f32.mrb[16].mxu0 }
 0x945   :  { %v1145_v39 = vadd.f32 %v1144_v38, %v1070_v37  ;;  %v2468_v40 = vpop.f32.mrb[17].mxu0 }
 0x946   :  { %v1147_v41 = vpop.f32.mrb[18].mxu0 }
 0x947   :  { %v1148_v42 = vadd.f32 %v1147_v41, %v1070_v37  ;;  %v2469_v43 = vpop.f32.mrb[19].mxu0  ;;  %v1151_v44 = vmax.f32 %v1145_v39, 0.0 }
 0x949   :  { %v1152_v45 = vmax.f32 %v1148_v42, 0.0 }
 0x94b   :  { %v1165_v46 = vpack.c.bf16 %v1152_v45, %v1151_v44 }
 0x94d   :  { %2483 = vmatmul.mubr.msk.bf16.vlgmr.msra.gmra.mrb[20].mxu1 %vm400_vm8, %v1165_v46 }
 0x94e   :  { %2504 = vmatprep.mubr.msk.bf16.mxu1 %vm2765_vm0, %v2764_v2  ;;  %2493 = vmatpush3.bf16.msra.mxu1 %v2689_v47 }
 0x94f   :  { %2494 = vmatprep.subr.bf16.mxu1 %v2764_v2 }
 0x952   :  { %2495 = vmatpush3.bf16.msra.mxu1 %v2690_v48 }
 0x953   :  { %2496 = vmatprep.subr.bf16.mxu1 %v2764_v2 }
 0x956   :  { %2497 = vmatpush3.bf16.msra.mxu1 %v2691_v49 }
 0x957   :  { %2498 = vmatprep.subr.bf16.mxu1 %v2764_v2 }
 0x95a   :  { %2499 = vmatpush3.bf16.msra.mxu1 %v2692_v50 }
 0x95b   :  { %2500 = vmatprep.subr.bf16.mxu1 %v2764_v2 }
 0x95e   :  { %2501 = vmatpush3.bf16.msra.mxu1 %v2693_v51 }
 0x95f   :  { %2502 = vmatprep.subr.bf16.mxu1 %v2764_v2 }
 0x962   :  { %2503 = vmatpush3.bf16.msra.mxu1 %v2694_v61 }
 0x963   :  { %2528 = vmatprep.subr.bf16.mxu1 %v2764_v2 }
 0xa20   :  { %v1240_v53 = vpop.f32.mrb[20].mxu1 }
 0xa21   :  { %v2484_v54 = vpop.f32.mrb[21].mxu1  ;;  %v1241_v56 = vadd.f32 %v1240_v53, %v1166_v52 }
 0xa22   :  { %v1243_v55 = vpop.f32.mrb[22].mxu1 }
 0xa23   :  { %v1244_v57 = vadd.f32 %v1243_v55, %v1166_v52  ;;  %v2485_v58 = vpop.f32.mrb[23].mxu1 }
 0xa25   :  { %v1248_v59 = vpack.c.bf16 %v1244_v57, %v1241_v56 }
 0xa27   :  { %2487 = vmatpush3.bf16.msra.mxu0 %v1248_v59 }
 0xa2a   :  { %2489 = vmatmul.mubr.msk.bf16.vlgmr.msra.gmra.mrb[20].mxu0 %vm1249_vm9, %v1247_v60 }
 0xa2b   :  { %2510 = vmatprep.mubr.msk.bf16.mxu0 %vm1401_vm10, %v2695_v7 }
 0xafd   :  { %v1287_v0 = vpop.f32.mrb[20].mxu0 }
 0xafe   :  { %v1295_v1 = vmul.f32 %v1294_v63, %v1287_v0  ;;  %v2490_v3 = vpop.f32.mrb[21].mxu0 }
 0xaff   :  { %v1290_v4 = vpop.f32.mrb[22].mxu0 }
 0xb00   :  { %v1296_v5 = vpack.c.bf16 %v1295_v1, %v1295_v1  ;;  %v2491_v6 = vpop.f32.mrb[23].mxu0 }
 0xb01   :  { %v2701_v6 = vld [vmem:[%s3366_s2 + $0x620] ss:$8 sps:$4 sm:$0xff]  }
 0xb02   :  { %2505 = vmatmul.mubr.msk.bf16.vlgmr.msra.gmra.mrb[24].mxu1 %vm400_vm8, %v1296_v5  ;;  %v1635_v5 = vld [vmem:[%s3366_s2 + $0x610] sm:$0x7] }
 0xb03   :  { %2532 = vmatprep.mubr.msk.bf16.mxu1 %vm2765_vm0, %v2764_v2 }
 0xbd5   :  { %v1383_v9 = vpop.f32.mrb[24].mxu1 }
 0xbd6   :  { %v1384_v10 = vadd.f32 %v1383_v9, %v1309_v8  ;;  %v2506_v11 = vpop.f32.mrb[25].mxu1 }
 0xbd7   :  { %v1386_v12 = vpop.f32.mrb[26].mxu1 }
 0xbd8   :  { %v1392_v13 = vpack.c.bf16 %v1384_v10, %v1384_v10  ;;  %v2507_v14 = vpop.f32.mrb[27].mxu1 }
 0xbd9   :  { %v1763_v14 = vld [vmem:[%s3366_s2 + $0x5c0] sm:$0xf] }
 0xbda   :  { %1472 = vrot.lane.b32.xlu1 %v1392_v13, %s2768_s9  ;;  %2584 = vmatprep.subr.msk.bf16.mxu0 %vm1408_vm11, %v1392_v13  ;;  %v1410_v15 = vsel %vm1408_vm11, %v1392_v13, 0  ;;  %v2702_v13 = vld [vmem:[%s3366_s2 + $0x630] ss:$0 sps:$4 sm:$0x11]  }
 0xbdb   :  { %2509 = vmatpush3.bf16.msra.mxu0 %v1410_v15  ;;  %v1771_v15 = vsel %vm253_vm1, %v1763_v14, 0 }
 0xbde   :  { %2511 = vmatmul.mubr.msk.bf16.vlgmr.msra.gmra.mrb[24].mxu0 %vm1401_vm10, %v2696_v16 }
 0xbdf   :  { %2516 = vmatprep.mubr.msk.bf16.mxu0 %vm1401_vm10, %v2697_v17 }
 0xc4c   :  { %v1473_v18 = vpop.permute.xlu1 %1472 }
 0xc4d   :  { %v1481_v19 = vsel %vm1408_vm11, %v1473_v18, 0  ;;  %2585 = vmatprep.subr.msk.bf16.mxu0 %vm1408_vm11, %v1473_v18 }
 0xc4e   :  { %2515 = vmatpush3.bf16.msra.mxu0 %v1481_v19 }
 0xc4f   :  { %2520 = vmatprep.subr.bf16.mxu0 %v2699_v21 }
 0xc51   :  { %2517 = vmatmul.mubr.msk.bf16.vlgmr.msra.gmra.mrb[28].mxu0 %vm1401_vm10, %v2698_v20 }
 0xc52   :  { %2521 = vmatpush3.bf16.msra.mxu0 %v2699_v21 }
 0xc53   :  { %2522 = vmatprep.subr.bf16.mxu0 %v2700_v22 }
 0xc56   :  { %2523 = vmatpush3.bf16.msra.mxu0 %v2700_v22 }
 0xcb1   :  { %v2512_v23 = vpop.f32.mrb[24].mxu0 }
 0xcb2   :  { %v1446_v24 = vpop.f32.mrb[25].mxu0 }
 0xcb3   :  { %v2513_v25 = vpop.f32.mrb[26].mxu0 }
 0xcb4   :  { %v1449_v26 = vpop.f32.mrb[27].mxu0 }
 0xd24   :  { %v2518_v27 = vpop.f32.mrb[28].mxu0 }
 0xd25   :  { %v1533_v28 = vmul.f32 %v2518_v27, %v2512_v23  ;;  %v1517_v29 = vpop.f32.mrb[29].mxu0 }
 0xd26   :  { %v1531_v30 = vmul.f32 %v1517_v29, %v1446_v24  ;;  %1825 = vrot.lane.b32.xlu1 %v1517_v29, %s2768_s9  ;;  %v2519_v32 = vpop.f32.mrb[30].mxu0 }
 0xd27   :  { %v1520_v33 = vpop.f32.mrb[31].mxu0  ;;  %v1535_v36 = vpack.c.bf16 %v1533_v28, %v1533_v28  ;;  %v2703_v28 = vld [vmem:[%s3366_s2 + $0x500] ss:$8 sps:$4 sm:$0xff]  }
 0xd28   :  { %v1532_v34 = vmul.f32 %v1520_v33, %v1449_v26 }
 0xd2a   :  { %v1534_v35 = vpack.c.bf16 %v1532_v34, %v1531_v30  ;;  %1827 = vrot.lane.b32.xlu1 %v1520_v33, %s2768_s9 }
 0xd2c   :  { %2524 = vmatprep.mubr.msk.bf16.mxu0 %vm308_vm6, %v1534_v35 }
 0xd2d   :  { %2525 = vmatmul.mubr.msk.bf16.vlgmr.msra.gmra.mrb[32].mxu0 %vm308_vm6, %v1535_v36 }
 0xd2e   :  { %1829 = vrot.lane.b32.xlu1 %v2518_v27, %s2768_s9  ;;  %2538 = vmatprep.mubr.msk.bf16.mxu0 %vm1401_vm10, %v2701_v6 }
 0xd98   :  { %v1826_v29 = vpop.permute.xlu1 %1825 }
 0xd9c   :  { %v1828_v30 = vpop.permute.xlu1 %1827 }
 0xda0   :  { %v1830_v34 = vpop.permute.xlu1 %1829 }
 0xe00   :  { %v2526_v31 = vpop.f32.mrb[32].mxu0 }
 0xe01   :  { %v1592_v37 = vpop.f32.mrb[33].mxu0  ;;  %v1608_v41 = vmul.f32 0.5, %v2526_v31 }
 0xe02   :  { %v1606_v38 = vmul.f32 0.5, %v1592_v37  ;;  %v2527_v39 = vpop.f32.mrb[34].mxu0 }
 0xe03   :  { %v1595_v40 = vpop.f32.mrb[35].mxu0  ;;  %v1613_v46 = vsel %vm1612_vm13, %v1608_v41, -inf }
 0xe04   :  { %v1607_v42 = vmul.f32 0.5, %v1595_v40  ;;  %v1610_v43 = vsel %vm1609_vm12, %v1606_v38, -inf }
 0xe06   :  { %v1611_v44 = vsel %vm1609_vm12, %v1607_v42, -inf }
 0xe07   :  { %v1614_v45 = vmax.f32 %v1610_v43, %v1611_v44  ;;  %v2704_v43 = vld [vmem:[%s3366_s2 + $0x510] ss:$8 sps:$4 sm:$0xff]   ;;  %v2705_v44 = vld [vmem:[%s3366_s2 + $0x520] ss:$8 sps:$4 sm:$0xff]  }
 0xe09   :  { %v1615_v47 = vmax.f32 %v1614_v45, %v1613_v46 }
 0xe0b   :  { %1616 = vmax.xlane.f32.xlu0 %v1615_v47 }
 0xe98   :  { %v1617_v48 = vpop.xlane.xlu0 %1616 }
 0xe99   :  { %v1618_v49 = vrot.slane %v1617_v48, 4 }
 0xe9b   :  { %v1619_v50 = vmax.f32 %v1617_v48, %v1618_v49 }
 0xe9d   :  { %v1620_v51 = vrot.slane %v1619_v50, 2 }
 0xe9f   :  { %v1621_v52 = vmax.f32 %v1619_v50, %v1620_v51  ;;  %v2706_v51 = vld [vmem:[%s3366_s2 + $0x530] ss:$8 sps:$4 sm:$0xff]  }
 0xea1   :  { %v1622_v53 = vrot.slane %v1621_v52, 1 }
 0xea3   :  { %v1623_v54 = vmax.f32 %v1621_v52, %v1622_v53  ;;  %v2707_v52 = vld [vmem:[%s3366_s2 + $0x540] ss:$8 sps:$4 sm:$0xff]   ;;  %v2708_v53 = vld [vmem:[%s3366_s2 + $0x550] ss:$8 sps:$4 sm:$0xff]  }
 0xea5   :  { %2588 = vpush %v1623_v54  ;;  %v1891_v54 = vld [vmem:[%s3367_s3 + $0x14] ss:$0 sm:$0xff] }
 0xed6   :  { %s2589_s19 = spop %2588 }
 0xed7   :  { %v1625_v55 = vstv %s2589_s19 }
 0xed8   :  { %v1626_v56 = vsub.f32 %v1606_v38, %v1625_v55  ;;  %v1627_v57 = vsub.f32 %v1607_v42, %v1625_v55  ;;  %v1628_v58 = vsub.f32 %v1608_v41, %v1625_v55  ;;  %v1821_v42 = vld [vmem:[%s3366_s2 + $0x640] sm:$0x1] }
 0xeda   :  { %v1629_v59 = vmul.f32 1.442695, %v1626_v56  ;;  %v1631_v60 = vmul.f32 1.442695, %v1627_v57  ;;  %v1633_v61 = vmul.f32 1.442695, %v1628_v58 }
 0xedc   :  { %2727 = vpow2.f32 %v1629_v59 }
 0xedd   :  { %2729 = vpow2.f32 %v1631_v60 }
 0xede   :  { %2731 = vpow2.f32 %v1633_v61  ;;  %v2709_v61 = vld [vmem:[%s3366_s2 + $0x560] ss:$8 sps:$4 sm:$0xff]  }
 0xee6   :  { %v2728_v62 = vpop.eup %2727 }
 0xee7   :  { %v2730_v63 = vpop.eup %2729 }
 0xee8   :  { %v2732_v0 = vpop.eup %2731  ;;  %v1636_v1 = vpack.c.bf16 %v2730_v63, %v2728_v62 }
 0xee9   :  { %v1637_v3 = vpack.c.bf16 %v2732_v0, %v2732_v0 }
 0xeea   :  { %2529 = vmatpush3.bf16.msra.mxu1 %v1636_v1 }
 0xeeb   :  { %2530 = vmatprep.subr.bf16.mxu1 %v2764_v2  ;;  %v1644_v4 = vsel %vm1642_vm14, %v1637_v3, 0 }
 0xeee   :  { %2531 = vmatpush3.bf16.msra.mxu1 %v1644_v4 }
 0xeef   :  { %2587 = vmatprep.subr.msk.bf16.mxu1 %vm253_vm1, %v1763_v14 }
 0xef1   :  { %2533 = vmatmul.mubr.msk.bf16.vlgmr.msra.gmra.mrb[28].mxu1 %vm1638_vm15, %v1635_v5 }
 0xef2   :  { %2543 = vmatpush3.bf16.msra.mxu1 %v1771_v15 }
 0xef3   :  { %2556 = vmatprep.subr.bf16.mxu1 %v2764_v2 }
 0xfc4   :  { %v1680_v7 = vpop.f32.mrb[28].mxu1 }
 0xfc5   :  { %v1689_v8 = vpack.c.bf16 %v1680_v7, %v1680_v7  ;;  %v2534_v9 = vpop.f32.mrb[29].mxu1 }
 0xfc6   :  { %v1683_v10 = vpop.f32.mrb[30].mxu1 }
 0xfc7   :  { %v1705_v11 = vsel %vm1408_vm11, %v1689_v8, 0  ;;  %v2535_v12 = vpop.f32.mrb[31].mxu1  ;;  %2586 = vmatprep.subr.msk.bf16.mxu0 %vm1408_vm11, %v1689_v8 }
 0xfc8   :  { %2537 = vmatpush3.bf16.msra.mxu0 %v1705_v11 }
 0xfc9   :  { %2548 = vmatprep.subr.bf16.mxu0 %v2764_v2 }
 0xfcb   :  { %2539 = vmatmul.mubr.msk.bf16.vlgmr.msra.gmra.mrb[36].mxu0 %vm1401_vm10, %v2702_v13 }
 0xfcc   :  { %2552 = vmatprep.mubr.msk.bf16.mxu0 %vm2765_vm0, %v2764_v2 }
0x109e   :  { %v2540_v16 = vpop.f32.mrb[36].mxu0 }
0x109f   :  { %2733 = vrcp.f32 %v2540_v16  ;;  %v1741_v17 = vpop.f32.mrb[37].mxu0 }
0x10a0   :  { %2735 = vrcp.f32 %v1741_v17  ;;  %v2541_v18 = vpop.f32.mrb[38].mxu0 }
0x10a1   :  { %v1744_v19 = vpop.f32.mrb[39].mxu0 }
0x10a2   :  { %2737 = vrcp.f32 %v1744_v19 }
0x10a9   :  { %v2734_v20 = vpop.eup %2733 }
0x10aa   :  { %v2736_v21 = vpop.eup %2735  ;;  %v1760_v23 = vmul.f32 %v2734_v20, %v2732_v0 }
0x10ab   :  { %v1758_v24 = vmul.f32 %v2736_v21, %v2728_v62  ;;  %v2710_v62 = vld [vmem:[%s3366_s2 + $0x570] ss:$8 sps:$4 sm:$0xff]   ;;  %s2093_s2 = sshll.u32 %s2769_s24, 4  ;;  %s2094_s2 = int_to_ptr.vmem [resolvable:$true] %s2093_s2 }
0x10ac   :  { %v2738_v22 = vpop.eup %2737  ;;  %v1762_v27 = vpack.c.bf16 %v1760_v23, %v1760_v23  ;;  %s2739_s1 = scalar_lea.vmem %s2094_s2, 32  ;;  %p2744_p1 = scmp.lt.s32.totalorder %s2094_s2, %s2094_s2 }
0x10ad   :  { %v1759_v25 = vmul.f32 %v2738_v22, %v2730_v63  ;;  %v1952_v63 = vld [vmem:[%s3367_s3 + $0x15] ss:$0 sm:$0xff]  ;;  %p2740_p0 = scmp.ne.s32.totalorder %s2094_s2, %s2739_s1  ;;  %p2745_p2 = scmp.lt.s32.totalorder %s2739_s1, %s2739_s1 }
0x10af   :  { %v1761_v26 = vpack.c.bf16 %v1759_v25, %v1758_v24  ;;  %p2746_p3 = por %p2745_p2, %p2744_p1 }
0x10b1   :  { %2544 = vmatprep.mubr.msk.bf16.mxu1 %vm1609_vm12, %v1761_v26  ;;  %p2747_p4 = pnand %p2746_p3, %p2740_p0 }
0x10b2   :  { %2545 = vmatmul.mubr.msk.bf16.vlgmr.msra.gmra.mrb[32].mxu1 %vm1609_vm12, %v1762_v27 }
0x10b3   :  { %2560 = vmatprep.mubr.msk.bf16.mxu1 %vm2765_vm0, %v2764_v2  ;;  %2557 = vmatpush3.bf16.msra.mxu1 %v2703_v28 }
0x10b4   :  { %2558 = vmatprep.subr.bf16.mxu1 %v2764_v2 }
0x10b7   :  { %2559 = vmatpush3.bf16.msra.mxu1 %v2704_v43 }
0x10b8   :  { %2572 = vmatprep.subr.bf16.mxu1 %v2764_v2 }
0x1185   :  { %v2546_v32 = vpop.f32.mrb[32].mxu1 }
0x1186   :  { %v1807_v33 = vpop.f32.mrb[33].mxu1  ;;  %v1836_v36 = vmul.f32 %v2546_v32, %v1830_v34 }
0x1187   :  { %v2547_v35 = vpop.f32.mrb[34].mxu1  ;;  %v1834_v37 = vmul.f32 %v1826_v29, %v1807_v33 }
0x1188   :  { %v1810_v31 = vpop.f32.mrb[35].mxu1  ;;  %v1838_v40 = vpack.c.bf16 %v1836_v36, %v1836_v36 }
0x1189   :  { %v1835_v38 = vmul.f32 %v1828_v30, %v1810_v31 }
0x118a   :  { %v1843_v41 = vsel %vm1642_vm14, %v1838_v40, 0 }
0x118b   :  { %v1837_v39 = vpack.c.bf16 %v1835_v38, %v1834_v37 }
0x118d   :  { %2549 = vmatpush3.bf16.msra.mxu0 %v1837_v39 }
0x118e   :  { %2550 = vmatprep.subr.bf16.mxu0 %v2764_v2 }
0x1191   :  { %2551 = vmatpush3.bf16.msra.mxu0 %v1843_v41 }
0x1192   :  { %2564 = vmatprep.subr.bf16.mxu0 %v2764_v2 }
0x1194   :  { %2553 = vmatmul.mubr.msk.bf16.vlgmr.msra.gmra.mrb[40].mxu0 %vm1638_vm15, %v1821_v42 }
0x1195   :  { %2568 = vmatprep.mubr.msk.bf16.mxu0 %vm2765_vm0, %v2764_v2  ;;  %2565 = vmatpush3.bf16.msra.mxu0 %v2705_v44 }
0x1196   :  { %2566 = vmatprep.subr.bf16.mxu0 %v2764_v2 }
0x1199   :  { %2567 = vmatpush3.bf16.msra.mxu0 %v2706_v51 }
0x1267   :  { %v1879_v45 = vpop.f32.mrb[40].mxu0 }
0x1268   :  { %v1885_v46 = vmul.f32 0.33333334, %v1879_v45  ;;  %v2554_v47 = vpop.f32.mrb[41].mxu0 }
0x1269   :  { %v1882_v48 = vpop.f32.mrb[42].mxu0 }
0x126a   :  { %v1886_v49 = vpack.c.bf16 %v1885_v46, %v1885_v46  ;;  %v2555_v50 = vpop.f32.mrb[43].mxu0 }
0x126c   :  { %2561 = vmatmul.mubr.msk.bf16.vlgmr.msra.gmra.mrb[36].mxu1 %vm308_vm6, %v1886_v49 }
0x126d   :  { %2580 = vmatprep.mubr.msk.bf16.mxu1 %vm2765_vm0, %v2764_v2  ;;  %2573 = vmatpush3.bf16.msra.mxu1 %v2707_v52 }
0x126e   :  { %2574 = vmatprep.subr.bf16.mxu1 %v2764_v2 }
0x1271   :  { %2575 = vmatpush3.bf16.msra.mxu1 %v2708_v53 }
0x1272   :  { %2576 = vmatprep.subr.bf16.mxu1 %v2764_v2 }
0x1275   :  { %2577 = vmatpush3.bf16.msra.mxu1 %v2709_v61 }
0x1276   :  { %2578 = vmatprep.subr.bf16.mxu1 %v2764_v2  ;;  %v2018_v2 = vld [vmem:[%s3367_s3 + $0x16] ss:$0 sm:$0xff] }
0x1279   :  { %2579 = vmatpush3.bf16.msra.mxu1 %v2710_v62 }
0x133f   :  { %v1941_v55 = vpop.f32.mrb[36].mxu1 }
0x1340   :  { %v1942_v56 = vadd.f32 %v1941_v55, %v1891_v54  ;;  %v2562_v57 = vpop.f32.mrb[37].mxu1 }
0x1341   :  { %v1944_v58 = vpop.f32.mrb[38].mxu1 }
0x1342   :  { %v1947_v59 = vpack.c.bf16 %v1942_v56, %v1942_v56  ;;  %v2563_v60 = vpop.f32.mrb[39].mxu1 }
0x1344   :  { %2569 = vmatmul.mubr.msk.bf16.vlgmr.msra.gmra.mrb[44].mxu0 %vm308_vm6, %v1947_v59 }
0x1417   :  { %v2002_v0 = vpop.f32.mrb[44].mxu0 }
0x1418   :  { %v2003_v1 = vadd.f32 %v2002_v0, %v1952_v63  ;;  %v2570_v3 = vpop.f32.mrb[45].mxu0 }
0x1419   :  { %v2005_v4 = vpop.f32.mrb[46].mxu0 }
0x141a   :  { %v2008_v5 = vmax.f32 %v2003_v1, 0.0  ;;  %v2571_v6 = vpop.f32.mrb[47].mxu0 }
0x141c   :  { %v2009_v7 = vpack.c.bf16 %v2008_v5, %v2008_v5 }
0x141e   :  { %2581 = vmatmul.mubr.msk.bf16.vlgmr.msra.gmra.mrb[40].mxu1 %vm311_vm7, %v2009_v7 }
0x14f1   :  { %v2080_v8 = vpop.f32.mrb[40].mxu1 }
0x14f2   :  { %v2081_v9 = vadd.f32 %v2080_v8, %v2018_v2  ;;  %v2582_v10 = vpop.f32.mrb[41].mxu1 }
0x14f3   :  { %v2083_v11 = vpop.f32.mrb[42].mxu1 }
0x14f4   :  { %2086 = vst [vmem:[#allocation2] sm:$0x3] %v2081_v9  ;;  %v2583_v12 = vpop.f32.mrb[43].mxu1 }
0x14f5   :  { %2750 = shalt.err (!%p2747_p4)
}
0x14f6   :  { %s2751_s3 = scalar_lea.hbm %s3368_s4, 32 }
0x14f7   :  { %p2752_p5 = scmp.ne.s32.totalorder %s3368_s4, %s2751_s3  ;;  %p2755_p6 = scmp.lt.u32.totalorder %s2751_s3, %s3368_s4 }
0x14f9   :  { %p2757_p7 = pnand %p2755_p6, %p2752_p5 }
0x14fb   :  { %2760 = shalt.err (!%p2757_p7)
}
0x14fc   :  { %2096 = dma.vmem_to_hbm [thread:$0]  %s2094_s2, 32, %s3368_s4, [#allocation3]  }
0x14fd   :  { %2761 = dma.done.wait [#allocation3], 32  }
0x14fe   :  { %2762 = vsyncadd [#allocation3], 4294967264 }
0x14ff   :  { %2100 = vsyncpa [#allocation3], 1 }

</bundles_post_ra>
